<compile_context>
chip_gen: v5e
topology: v5e:2x2
jax: 0.10.0
libtpu: 0.0.40
codegen_flags: <defaults>
</compile_context>

<pallas_src>
import functools

import jax
import jax.numpy as jnp
from jax.experimental import pallas as pl
from jax.experimental.pallas import tpu as pltpu


def _round_up(x: int, m: int) -> int:
    return ((x + m - 1) // m) * m


def _ed_kernel(*refs, ignore_descriptions: bool, ignore_types: bool, num_cands: int):
    """One entity tile.  Ref order (refs omitted when a flag disables them):

       [class_act (tE,C), cand_cls (tE,K*C), t_bcast (C,K*C), s_w (K*C,K+1), s_unit (K*C,K+1)]
                                                                  -- only if not ignore_types
       pem (tE,K+1)
       [desc (tE,K+1)]                                            -- only if not ignore_descriptions
       scalars SMEM (4,) = (w_pem, w_dist, w_desc, bias)
       out (tE,K+1)
    """
    it = iter(refs)
    if not ignore_types:
        ca_ref = next(it)
        cc_ref = next(it)
        t_ref = next(it)
        sw_ref = next(it)
        s1_ref = next(it)
    pem_ref = next(it)
    if not ignore_descriptions:
        desc_ref = next(it)
    scal_ref = next(it)
    out_ref = next(it)

    K = num_cands
    tE, K1 = out_ref.shape

    w_pem = scal_ref[0]
    w_dist = scal_ref[1]
    w_desc = scal_ref[2]
    bias = scal_ref[3]

    pem = pem_ref[...]                               # (tE, K+1) f32; column K is padding
    logits = pem * w_pem + bias                      # (tE, K+1)

    if not ignore_types:
        ca = ca_ref[...].astype(jnp.float32)         # (tE, C)
        cc = cc_ref[...].astype(jnp.float32)         # (tE, K*C) lane-dense
        hi = jax.lax.Precision.HIGHEST
        # Broadcast the predicted-class vector across the K candidate groups on the MXU
        # (t_bcast[c, k*C+c] = 1) -> avoids lane concat/reshape relayouts, MXU is otherwise idle.
        ca_t = jnp.dot(ca, t_ref[...], precision=hi,
                       preferred_element_type=jnp.float32)        # (tE, K*C)
        # Group sums on the MXU: column k of s_* sums the C classes of candidate k; the last
        # column is all-zero so the "none of the above" lane comes out as 0.
        delta = jnp.dot(cc * ca_t, sw_ref[...], precision=hi,
                        preferred_element_type=jnp.float32)       # sum_c cc*ca*w_c    (tE, K+1)
        diff = cc - ca_t
        sqsum = jnp.dot(diff * diff, s1_ref[...], precision=hi,
                        preferred_element_type=jnp.float32)       # sum_c (cc-ca)^2    (tE, K+1)
        logits = logits + delta + jnp.sqrt(sqsum) * w_dist

    if not ignore_descriptions:
        logits = logits + desc_ref[...].astype(jnp.float32) * w_desc

    # Single full-tile store: candidates with pem==0 -> -1e8; "none of the above" column -> 0.
    col = jax.lax.broadcasted_iota(jnp.int32, (tE, K1), 1)
    masked = jnp.where(pem == 0.0, jnp.float32(-100000000.0), logits)
    out_ref[...] = jnp.where(col == K, jnp.float32(0.0), masked)


@functools.partial(jax.jit,
                   static_argnames=("ignore_descriptions", "ignore_types", "block_e"))
def entity_disambiguation_forward(class_activations,
                                  candidate_pem_values,
                                  candidate_classes,
                                  candidate_description_scores,
                                  weight, bias,
                                  *,
                                  ignore_descriptions: bool = False,
                                  ignore_types: bool = False,
                                  block_e: int = 2048):
    """Returns (None, logits_with_none_above), matching the PyTorch module at inference."""
    E, C = class_activations.shape
    _, K = candidate_pem_values.shape
    K1 = K + 1
    assert candidate_classes.shape == (E, K, C)
    assert candidate_description_scores.shape == (E, K1)
    assert weight.shape == (C + 3,)

    # Entity tile: large (default 2048, sweepable) to amortise ~0.35us per-grid-step overhead,
    # a multiple of 8 (sublane), never larger than the rounded-up entity count.  E need not be a
    # multiple of the tile: the ragged final block is read-padded / write-clipped by Pallas, so
    # the dominant (E, K*C) tensor is never copied by a wrapper-side pad.
    block_e_eff = max(8, min(_round_up(block_e, 8), _round_up(E, 8)))
    grid_e = pl.cdiv(E, block_e_eff)

    weight = jnp.asarray(weight, jnp.float32)
    scalars = jnp.stack([weight[C], weight[C + 1], weight[C + 2],
                         jnp.asarray(bias, jnp.float32).reshape(())])

    # pem gets one extra lane so the whole kernel works on (tE, K+1); tiny copy (E*(K+1)*4 B).
    pem_pad = jnp.pad(candidate_pem_values.astype(jnp.float32), ((0, 0), (0, 1)))

    inputs, in_specs = [], []
    if not ignore_types:
        # Lane-dense view of the candidate classes (contiguous dims -> free reshape under jit).
        cc_flat = candidate_classes.reshape(E, K * C)
        # Constant MXU matrices (built once in the wrapper; ~50 KiB total):
        #   t_bcast[c, k*C + c]  = 1           broadcast predicted classes across candidates
        #   s_unit [k*C + c, k]  = 1           per-candidate sum (squared-distance term)
        #   s_w    [k*C + c, k]  = w_class[c]  per-candidate weighted sum (delta term)
        # Their last output column is all-zero -> the "none of the above" lane is 0 by construction.
        lane = jnp.arange(K * C, dtype=jnp.int32)
        t_bcast = (jnp.arange(C, dtype=jnp.int32)[:, None] == (lane % C)[None, :]
                   ).astype(jnp.float32)                                        # (C, K*C)
        grp = (lane // C)[:, None]
        cols = jnp.arange(K1, dtype=jnp.int32)[None, :]
        s_unit = (grp == cols).astype(jnp.float32)                              # (K*C, K+1)
        s_w = s_unit * jnp.tile(weight[:C], (K,))[:, None]                      # (K*C, K+1)

        inputs += [class_activations, cc_flat, t_bcast, s_w, s_unit]
        in_specs += [
            pl.BlockSpec((block_e_eff, C), lambda i: (i, 0)),
            pl.BlockSpec((block_e_eff, K * C), lambda i: (i, 0)),
            pl.BlockSpec((C, K * C), lambda i: (0, 0)),
            pl.BlockSpec((K * C, K1), lambda i: (0, 0)),
            pl.BlockSpec((K * C, K1), lambda i: (0, 0)),
        ]
    inputs.append(pem_pad)
    in_specs.append(pl.BlockSpec((block_e_eff, K1), lambda i: (i, 0)))
    if not ignore_descriptions:
        inputs.append(candidate_description_scores)
        in_specs.append(pl.BlockSpec((block_e_eff, K1), lambda i: (i, 0)))
    inputs.append(scalars)
    in_specs.append(pl.BlockSpec(memory_space=pltpu.MemorySpace.SMEM))

    kernel = functools.partial(_ed_kernel,
                               ignore_descriptions=ignore_descriptions,
                               ignore_types=ignore_types,
                               num_cands=K)

    out = pl.pallas_call(
        kernel,
        out_shape=jax.ShapeDtypeStruct((E, K1), jnp.float32),
        grid_spec=pltpu.PrefetchScalarGridSpec(
            num_scalar_prefetch=0,
            grid=(grid_e,),
            in_specs=in_specs,
            out_specs=pl.BlockSpec((block_e_eff, K1), lambda i: (i, 0)),
        ),
        compiler_params=pltpu.CompilerParams(
            dimension_semantics=("parallel",),
            vmem_limit_bytes=32 * 1024 * 1024,
        ),
    )(*inputs)

    return None, out


def _reference(class_activations, candidate_pem_values, candidate_classes,
               candidate_description_scores, weight, bias,
               ignore_descriptions=False, ignore_types=False):
    """Plain-JAX port of the PyTorch forward (dropout = identity), for validation."""
    ca = class_activations.astype(jnp.float32)
    cc = candidate_classes.astype(jnp.float32)
    pem = candidate_pem_values.astype(jnp.float32)
    desc = candidate_description_scores.astype(jnp.float32)

    pce = ca[:, None, :]
    diff = cc - pce
    dist = jnp.sqrt(jnp.sum(diff ** 2, axis=2))[..., None]
    delta = cc * pce
    if ignore_descriptions:
        desc = jnp.zeros_like(desc)
    if ignore_types:
        delta = jnp.zeros_like(delta)
        dist = jnp.zeros_like(dist)
    feats = jnp.concatenate(
        [delta, pem[..., None], dist, desc[:, :-1, None]], axis=2)
    logits = feats @ weight[:, None] + bias                       # (E, K, 1)
    E = logits.shape[0]
    lw = jnp.concatenate([logits, jnp.zeros((E, 1, 1))], axis=1)[..., 0]
    pem_full = jnp.concatenate([pem, jnp.ones((E, 1))], axis=1)
    mask = (pem_full == 0).astype(jnp.float32) * jnp.float32(-100000000.0)
    mask_zero = (mask == 0).astype(jnp.float32)
    return lw * mask_zero + mask


if __name__ == "__main__":
    E, K, C = 20, 8, 32       # entities (deliberately not a multiple of 8), candidates, classes
    key = jax.random.PRNGKey(0)
    k1, k2, k3, k4, k5, k6 = jax.random.split(key, 6)

    class_activations = jax.random.uniform(k1, (E, C), jnp.float32)
    # candidate_classes supplied in bf16 (dominant HBM traffic); kernel upcasts to f32.
    candidate_classes = jax.random.uniform(k2, (E, K, C), jnp.float32).astype(jnp.bfloat16)
    pem = jax.random.uniform(k3, (E, K), jnp.float32)
    pem = pem * (jax.random.uniform(k4, (E, K)) > 0.3).astype(jnp.float32)  # exercise the mask
    desc_scores = jax.random.normal(k5, (E, K + 1), jnp.float32)

    # nn.Linear(num_classes + 3, 1): weight ~ N(0, 0.02), bias = 0
    weight = jax.random.normal(k6, (C + 3,), jnp.float32) * 0.02
    bias = jnp.float32(0.0)

    expected = _reference(class_activations, pem, candidate_classes, desc_scores, weight, bias)

    # Default (large) tile -> single ragged block.
    _, logits = entity_disambiguation_forward(
        class_activations, pem, candidate_classes, desc_scores, weight, bias)
    logits = jax.block_until_ready(logits)
    assert logits.shape == (E, K + 1)
    assert jnp.allclose(logits, expected, atol=2e-4, rtol=2e-4), "mismatch vs reference"

    # Small tile -> multiple grid steps + ragged final block.
    _, logits_small = entity_disambiguation_forward(
        class_activations, pem, candidate_classes, desc_scores, weight, bias, block_e=8)
    logits_small = jax.block_until_ready(logits_small)
    assert jnp.allclose(logits_small, expected, atol=2e-4, rtol=2e-4), \
        "mismatch vs reference (block_e=8)"

    # ignore_types variant (candidate_classes never streamed).
    expected_nt = _reference(class_activations, pem, candidate_classes, desc_scores, weight,
                             bias, ignore_types=True)
    _, logits_nt = entity_disambiguation_forward(
        class_activations, pem, candidate_classes, desc_scores, weight, bias,
        ignore_types=True)
    logits_nt = jax.block_until_ready(logits_nt)
    assert jnp.allclose(logits_nt, expected_nt, atol=2e-4, rtol=2e-4), \
        "mismatch vs reference (ignore_types)"

    # Both flags.
    expected_flags = _reference(class_activations, pem, candidate_classes, desc_scores, weight,
                                bias, ignore_descriptions=True, ignore_types=True)
    _, logits_flags = entity_disambiguation_forward(
        class_activations, pem, candidate_classes, desc_scores, weight, bias,
        ignore_descriptions=True, ignore_types=True)
    logits_flags = jax.block_until_ready(logits_flags)
    assert jnp.allclose(logits_flags, expected_flags, atol=2e-4, rtol=2e-4), \
        "mismatch vs reference (ignore flags)"

    print("KERNEL_OK")
</pallas_src>

<mosaic_0001>
module attributes {stable_mosaic.version = 11 : i64} {
  func.func @_ed_kernel(%arg0: i32, %arg1: memref<24x32xf32, #tpu.memory_space<vmem>>, %arg2: memref<24x256xbf16, #tpu.memory_space<vmem>>, %arg3: memref<32x256xf32, #tpu.memory_space<vmem>>, %arg4: memref<256x9xf32, #tpu.memory_space<vmem>>, %arg5: memref<256x9xf32, #tpu.memory_space<vmem>>, %arg6: memref<24x9xf32, #tpu.memory_space<vmem>>, %arg7: memref<24x9xf32, #tpu.memory_space<vmem>>, %arg8: memref<4xf32, #tpu.memory_space<smem>>, %arg9: memref<24x9xf32, #tpu.memory_space<vmem>>) attributes {dimension_semantics = [#tpu.dimension_semantics<parallel>], iteration_bounds = array<i64: 1>, scalar_prefetch = 0 : i64, scratch_operands = 0 : i64, tpu.core_type = #tpu.core_type<tc>, window_params = [{transform_indices = @transform_0, window_bounds = array<i64: 24, 32>}, {transform_indices = @transform_1, window_bounds = array<i64: 24, 256>}, {pipeline_mode = #tpu.pipeline_mode<synchronous>, transform_indices = @transform_2, window_bounds = array<i64: 32, 256>}, {pipeline_mode = #tpu.pipeline_mode<synchronous>, transform_indices = @transform_3, window_bounds = array<i64: 256, 9>}, {pipeline_mode = #tpu.pipeline_mode<synchronous>, transform_indices = @transform_4, window_bounds = array<i64: 256, 9>}, {transform_indices = @transform_5, window_bounds = array<i64: 24, 9>}, {transform_indices = @transform_6, window_bounds = array<i64: 24, 9>}, {transform_indices = @transform_7, window_bounds = array<i64: 4>}, {transform_indices = @transform_8, window_bounds = array<i64: 24, 9>}]} {
    %c0 = arith.constant 0 : index
    %0 = memref.load %arg8[%c0] : memref<4xf32, #tpu.memory_space<smem>>
    %c1 = arith.constant 1 : index
    %1 = memref.load %arg8[%c1] : memref<4xf32, #tpu.memory_space<smem>>
    %c2 = arith.constant 2 : index
    %2 = memref.load %arg8[%c2] : memref<4xf32, #tpu.memory_space<smem>>
    %c3 = arith.constant 3 : index
    %3 = memref.load %arg8[%c3] : memref<4xf32, #tpu.memory_space<smem>>
    %c0_0 = arith.constant 0 : index
    %c0_1 = arith.constant 0 : index
    %4 = vector.load %arg6[%c0_0, %c0_1] : memref<24x9xf32, #tpu.memory_space<vmem>>, vector<24x9xf32>
    %5 = vector.broadcast %0 : f32 to vector<24x9xf32>
    %6 = arith.mulf %4, %5 : vector<24x9xf32>
    %7 = vector.broadcast %3 : f32 to vector<24x9xf32>
    %8 = arith.addf %6, %7 : vector<24x9xf32>
    %c0_2 = arith.constant 0 : index
    %c0_3 = arith.constant 0 : index
    %9 = vector.load %arg1[%c0_2, %c0_3] : memref<24x32xf32, #tpu.memory_space<vmem>>, vector<24x32xf32>
    %c0_4 = arith.constant 0 : index
    %c0_5 = arith.constant 0 : index
    %10 = vector.load %arg2[%c0_4, %c0_5] : memref<24x256xbf16, #tpu.memory_space<vmem>>, vector<24x256xbf16>
    %11 = arith.extf %10 : vector<24x256xbf16> to vector<24x256xf32>
    %c0_6 = arith.constant 0 : index
    %c0_7 = arith.constant 0 : index
    %12 = vector.load %arg3[%c0_6, %c0_7] : memref<32x256xf32, #tpu.memory_space<vmem>>, vector<32x256xf32>
    %cst = arith.constant dense<0.000000e+00> : vector<24x256xf32>
    %13 = tpu.matmul %9, %12, %cst {dimension_numbers = #tpu.dot_dimension_numbers<[1], [0], [0], [1], [0, 0, 1, 1], [], []>, precision = #tpu.contract_precision<fp32>} : vector<24x32xf32>, vector<32x256xf32>, vector<24x256xf32> -> vector<24x256xf32>
    %14 = arith.mulf %11, %13 : vector<24x256xf32>
    %c0_8 = arith.constant 0 : index
    %c0_9 = arith.constant 0 : index
    %15 = vector.load %arg4[%c0_8, %c0_9] : memref<256x9xf32, #tpu.memory_space<vmem>>, vector<256x9xf32>
    %cst_10 = arith.constant dense<0.000000e+00> : vector<24x9xf32>
    %16 = tpu.matmul %14, %15, %cst_10 {dimension_numbers = #tpu.dot_dimension_numbers<[1], [0], [0], [1], [0, 0, 1, 1], [], []>, precision = #tpu.contract_precision<fp32>} : vector<24x256xf32>, vector<256x9xf32>, vector<24x9xf32> -> vector<24x9xf32>
    %17 = arith.subf %11, %13 : vector<24x256xf32>
    %18 = arith.mulf %17, %17 : vector<24x256xf32>
    %c0_11 = arith.constant 0 : index
    %c0_12 = arith.constant 0 : index
    %19 = vector.load %arg5[%c0_11, %c0_12] : memref<256x9xf32, #tpu.memory_space<vmem>>, vector<256x9xf32>
    %cst_13 = arith.constant dense<0.000000e+00> : vector<24x9xf32>
    %20 = tpu.matmul %18, %19, %cst_13 {dimension_numbers = #tpu.dot_dimension_numbers<[1], [0], [0], [1], [0, 0, 1, 1], [], []>, precision = #tpu.contract_precision<fp32>} : vector<24x256xf32>, vector<256x9xf32>, vector<24x9xf32> -> vector<24x9xf32>
    %21 = arith.addf %8, %16 : vector<24x9xf32>
    %22 = math.sqrt %20 : vector<24x9xf32>
    %23 = vector.broadcast %1 : f32 to vector<24x9xf32>
    %24 = arith.mulf %22, %23 : vector<24x9xf32>
    %25 = arith.addf %21, %24 : vector<24x9xf32>
    %c0_14 = arith.constant 0 : index
    %c0_15 = arith.constant 0 : index
    %26 = vector.load %arg7[%c0_14, %c0_15] : memref<24x9xf32, #tpu.memory_space<vmem>>, vector<24x9xf32>
    %27 = vector.broadcast %2 : f32 to vector<24x9xf32>
    %28 = arith.mulf %26, %27 : vector<24x9xf32>
    %29 = arith.addf %25, %28 : vector<24x9xf32>
    %30 = tpu.iota {dimensions = array<i32: 1>} : vector<24x9xi32>
    %cst_16 = arith.constant 0.000000e+00 : f32
    %31 = vector.broadcast %cst_16 : f32 to vector<24x9xf32>
    %32 = arith.cmpf oeq, %4, %31 : vector<24x9xf32>
    %cst_17 = arith.constant -1.000000e+08 : f32
    %33 = vector.broadcast %cst_17 : f32 to vector<24x9xf32>
    %34 = arith.select %32, %33, %29 : vector<24x9xi1>, vector<24x9xf32>
    %c8_i32 = arith.constant 8 : i32
    %35 = vector.broadcast %c8_i32 : i32 to vector<24x9xi32>
    %36 = arith.cmpi eq, %30, %35 : vector<24x9xi32>
    %cst_18 = arith.constant 0.000000e+00 : f32
    %37 = vector.broadcast %cst_18 : f32 to vector<24x9xf32>
    %38 = arith.select %36, %37, %34 : vector<24x9xi1>, vector<24x9xf32>
    %c0_19 = arith.constant 0 : index
    %c0_20 = arith.constant 0 : index
    %39 = vector.load %arg9[%c0_19, %c0_20] : memref<24x9xf32, #tpu.memory_space<vmem>>, vector<24x9xf32>
    tpu.vector_store %arg9[%c0_19, %c0_20], %38 {strides = array<i32>} : memref<24x9xf32, #tpu.memory_space<vmem>>, vector<24x9xf32>,
    return
  }
  func.func @transform_0(%arg0: i32) -> (i32, i32) {
    %c0_i32 = arith.constant 0 : i32
    %c0_i32_0 = arith.constant 0 : i32
    return %arg0, %c0_i32 : i32, i32
  }
  func.func @transform_1(%arg0: i32) -> (i32, i32) {
    %c0_i32 = arith.constant 0 : i32
    %c0_i32_0 = arith.constant 0 : i32
    return %arg0, %c0_i32 : i32, i32
  }
  func.func @transform_2(%arg0: i32) -> (i32, i32) {
    %c0_i32 = arith.constant 0 : i32
    %c0_i32_0 = arith.constant 0 : i32
    %c0_i32_1 = arith.constant 0 : i32
    return %c0_i32, %c0_i32_0 : i32, i32
  }
  func.func @transform_3(%arg0: i32) -> (i32, i32) {
    %c0_i32 = arith.constant 0 : i32
    %c0_i32_0 = arith.constant 0 : i32
    %c0_i32_1 = arith.constant 0 : i32
    return %c0_i32, %c0_i32_0 : i32, i32
  }
  func.func @transform_4(%arg0: i32) -> (i32, i32) {
    %c0_i32 = arith.constant 0 : i32
    %c0_i32_0 = arith.constant 0 : i32
    %c0_i32_1 = arith.constant 0 : i32
    return %c0_i32, %c0_i32_0 : i32, i32
  }
  func.func @transform_5(%arg0: i32) -> (i32, i32) {
    %c0_i32 = arith.constant 0 : i32
    %c0_i32_0 = arith.constant 0 : i32
    return %arg0, %c0_i32 : i32, i32
  }
  func.func @transform_6(%arg0: i32) -> (i32, i32) {
    %c0_i32 = arith.constant 0 : i32
    %c0_i32_0 = arith.constant 0 : i32
    return %arg0, %c0_i32 : i32, i32
  }
  func.func @transform_7(%arg0: i32) -> i32 {
    %c0_i32 = arith.constant 0 : i32
    %c0_i32_0 = arith.constant 0 : i32
    return %c0_i32 : i32
  }
  func.func @transform_8(%arg0: i32) -> (i32, i32) {
    %c0_i32 = arith.constant 0 : i32
    %c0_i32_0 = arith.constant 0 : i32
    return %arg0, %c0_i32 : i32, i32
  }
}

</mosaic_0001>

<bundles_post_ra>
// kernel: mul.5
= control target key start
LH: loop header
LB: loop body
LE: loop exit
PB: predicated region body
PF: predicated region fallthrough
CT: control target
= control target key end

     0   :  { %s7_s6 = smov 3  ;;  %s39_s9 = smov 96   ;;  %vm4_vm0 = vcmask 261120   ;;  %vm11_vm1 = vcmask 1048320   ;;  %vm18_vm2 = vcmask 785920   ;;  %vm25_vm3 = vcmask 523520   ;;  %s67_s0 = inlined_call_operand.vmem [shape: f32[8,32], index: 0, kind: input, shape index: {}]   ;;  %s68_s1 = inlined_call_operand.vmem [shape: f32[256], index: 1, kind: output, shape index: {}]  }
   0x1   :  { %v33_v0 = vld [vmem:[%s67_s0 + $0x3] ss:$4 sm:%s7_s6]   ;;  %s21_s10 = smov 3  ;;  %s14_s13 = smov 3 }
   0x2   :  { %9 = vrot.lane.b32.xlu0 %v33_v0, %s39_s9  ;;  %v35_v1 = vld [vmem:[%s67_s0 + $0x1] ss:$4 sm:%s21_s10]   ;;  %s40_s14 = smov 32   ;;  %s41_s17 = smov 64  }
   0x3   :  { %23 = vrot.lane.b32.xlu1 %v35_v1, %s40_s14  ;;  %v34_v2 = vld [vmem:[%s67_s0 + $0x2] ss:$4 sm:%s14_s13]   ;;  %s2_s18 = smov 3 }
   0x4   :  { %v3_v3 = vld [vmem:[%s67_s0] ss:$4 sm:%s2_s18]  }
   0x5   :  { %5 = vst.msk [vmem:[#allocation0] sm:$0x3] %vm4_vm0, %v3_v3  }
   0xa   :  { %16 = vrot.lane.b32.xlu0 %v34_v2, %s41_s17 }
  0x74   :  { %v10_v4 = vpop.permute.xlu0 %9  }
  0x75   :  { %12 = vst.msk [vmem:[#allocation0] sm:$0x3] %vm11_vm1, %v10_v4   ;;  %v24_v5 = vpop.permute.xlu1 %23  }
  0x7c   :  { %v17_v6 = vpop.permute.xlu0 %16  }
  0x7d   :  { %19 = vst.msk [vmem:[#allocation0] sm:$0x3] %vm18_vm2, %v17_v6  }
  0x7e   :  { %26 = vst.msk [vmem:[#allocation0] sm:$0x3] %vm25_vm3, %v24_v5  }
  0x85   :  { %v29_v7 = vld [vmem:[#allocation0] sm:$0x3] }
  0x86   :  { %32 = vst [vmem:[%s68_s1] sm:$0x3] %v29_v7 }

// kernel: tile.8
= control target key start
LH: loop header
LB: loop body
LE: loop exit
PB: predicated region body
PF: predicated region fallthrough
CT: control target
= control target key end

     0   :  { %s22_s0 = inlined_call_operand.vmem [shape: f32[32], index: 0, kind: input, shape index: {}]   ;;  %s23_s1 = inlined_call_operand.vmem [shape: f32[8,32], index: 1, kind: output, shape index: {}]  }
   0x1   :  { %v4_v0 = vld [vmem:[%s22_s0] ss:$0 sm:$0xff] }
   0x2   :  { %5 = vst [vmem:[%s23_s1] sm:$0xff] %v4_v0 }

// kernel: entity_disambiguation_forward.1
= control target key start
LH: loop header
LB: loop body
LE: loop exit
PB: predicated region body
PF: predicated region fallthrough
CT: control target
= control target key end

     0   :  { %13 = vsyncpa [#allocation3], 0  ;;  %s2376_s30 = smov [#allocation2]   ;;  %s4001_s0 = inlined_call_operand.vmem [shape: f32[20,32], index: 0, kind: input, shape index: {}]   ;;  %s4002_s1 = inlined_call_operand.vmem [shape: bf16[20,256], index: 1, kind: input, shape index: {}]   ;;  %s4003_s2 = inlined_call_operand.vmem [shape: f32[32,256], index: 2, kind: input, shape index: {}]   ;;  %s4004_s3 = inlined_call_operand.vmem [shape: f32[256,9], index: 3, kind: input, shape index: {}]   ;;  %s4005_s4 = inlined_call_operand.vmem [shape: f32[256,9], index: 4, kind: input, shape index: {}]   ;;  %s4006_s5 = inlined_call_operand.vmem [shape: f32[20,9], index: 5, kind: input, shape index: {}]   ;;  %s4007_s6 = inlined_call_operand.vmem [shape: f32[20,9], index: 6, kind: input, shape index: {}]   ;;  %s4008_s7 = inlined_call_operand.vmem [shape: f32[4], index: 7, kind: input, shape index: {}]   ;;  %s4009_s8 = inlined_call_operand.vmem [shape: f32[20,9], index: 8, kind: output, shape index: {}]  }
   0x1   :  { %s33_s29 = sshll.u32 %s4008_s7, 4  ;;  %s34_s29 = int_to_ptr.vmem [resolvable:$true] %s33_s29 }
   0x2   :  { %36 = dma.vmem_to_smem %s34_s29, 16, %s2376_s30, [#allocation3]  }
   0x3   :  { %2374 = dma.done.wait [#allocation3], 16  }
   0x4   :  { %2375 = vsyncadd [#allocation3], 4294967280 }
   0x5   :  { %41 = sfence }
   0x6   :  { %v75_v0 = vld [vmem:[%s4003_s2 + $0x30] sm:$0xff]  ;;  %v73_v1 = vld [vmem:[%s4003_s2 + $0x20] sm:$0xff]  ;;  %vm77_vm0 = vcmask 261120   ;;  %v76_v8 = vld [vmem:[%s4003_s2 + $0x38] sm:$0xff]  ;;  %s2354_s9 = sld [smem:[#allocation2 + $0x3]]  ;;  %vm2343_vm5 = vcmask 72704  }
   0x7   :  { %v71_v2 = vld [vmem:[%s4003_s2 + $0x10] sm:$0xff]  ;;  %v2434_v3 = vand.u32 4294901760, %v75_v0  ;;  %v2436_v4 = vand.u32 4294901760, %v73_v1  ;;  %v69_v6 = vld [vmem:[%s4003_s2] sm:$0xff]  ;;  %v2452_v11 = vand.u32 4294901760, %v76_v8  ;;  %v58_v12 = vld [vmem:[%s4001_s0 + $0x8] sm:$0xff] }
   0x8   :  { %v2438_v5 = vand.u32 4294901760, %v71_v2  ;;  %v57_v7 = vld [vmem:[%s4001_s0] sm:$0xff]  ;;  %v2449_v9 = vand.u32 4294901760, %v69_v6  ;;  %v74_v13 = vld [vmem:[%s4003_s2 + $0x28] sm:$0xff]  ;;  %v82_v20 = vsel %vm77_vm0, %v58_v12, 0  ;;  %v72_v37 = vld [vmem:[%s4003_s2 + $0x18] sm:$0xff] }
   0x9   :  { %v79_v10 = vsel %vm77_vm0, %v57_v7, 0  ;;  %100 = vmatpush.msra.mxu0 %v2434_v3  ;;  %v145_v14 = vsub.f32 %v75_v0, %v2434_v3  ;;  %234 = vmatpush.msra.mxu3 %v2434_v3  ;;  %v2464_v15 = vsub.f32 %v73_v1, %v2436_v4  ;;  %v2475_v19 = vsub.f32 %v76_v8, %v2452_v11  ;;  %v59_v38 = vld [vmem:[%s4001_s0 + $0x10] sm:$0xff]  ;;  %v70_v39 = vld [vmem:[%s4003_s2 + $0x8] sm:$0xff]  ;;  %v598_v12 = vld [vmem:[%s4004_s3 + $0x58] sm:$0xff]  ;;  %s2352_s12 = sld [smem:[#allocation2 + $0x1]] }
   0xa   :  { %v2467_v16 = vsub.f32 %v71_v2, %v2438_v5  ;;  %v2469_v17 = vand.u32 4294901760, %v79_v10  ;;  %v2472_v18 = vsub.f32 %v69_v6, %v2449_v9  ;;  %v2478_v21 = vand.u32 4294901760, %v74_v13  ;;  %v600_v7 = vld [vmem:[%s4004_s3 + $0x68] sm:$0xff]  ;;  %s2353_s13 = sld [smem:[#allocation2 + $0x2]] }
   0xb   :  { %102 = vmatpush.msra.mxu0 %v2436_v4  ;;  %195 = vmatpush.msra.mxu2 %v145_v14  ;;  %v146_v22 = vand.u32 4294901760, %v145_v14  ;;  %v152_v24 = vand.u32 4294901760, %v2464_v15  ;;  %v393_v26 = vand.u32 4294901760, %v2475_v19  ;;  %v2489_v28 = vand.u32 4294901760, %v82_v20 }
   0xc   :  { %v2482_v23 = vsub.f32 %v79_v10, %v2469_v17  ;;  %v158_v25 = vand.u32 4294901760, %v2467_v16  ;;  %236 = vmatpush.msra.mxu3 %v2436_v4  ;;  %v164_v27 = vand.u32 4294901760, %v2472_v18  ;;  %v2492_v29 = vsub.f32 %v74_v13, %v2478_v21  ;;  %v597_v13 = vld [vmem:[%s4004_s3 + $0x50] sm:$0xff] }
   0xd   :  { %104 = vmatpush.msra.mxu0 %v2438_v5  ;;  %198 = vmatpush.msra.mxu2 %v2464_v15  ;;  %v147_v30 = vsub.f32 %v145_v14, %v146_v22  ;;  %v153_v32 = vsub.f32 %v2464_v15, %v152_v24  ;;  %v394_v34 = vsub.f32 %v2475_v19, %v393_v26  ;;  %v350_v49 = vand.u32 4294901760, %v72_v37 }
   0xe   :  { %v2497_v31 = vand.u32 4294901760, %v2482_v23  ;;  %v159_v33 = vsub.f32 %v2467_v16, %v158_v25  ;;  %238 = vmatpush.msra.mxu3 %v2438_v5  ;;  %v2506_v35 = vsub.f32 %v82_v20, %v2489_v28  ;;  %v399_v36 = vand.u32 4294901760, %v2492_v29 }
   0xf   :  { %106 = vmatpush.msra.mxu0 %v2449_v9  ;;  %v148_v40 = vand.u32 4294901760, %v147_v30  ;;  %201 = vmatpush.msra.mxu2 %v2467_v16  ;;  %v154_v42 = vand.u32 4294901760, %v153_v32  ;;  %v165_v43 = vsub.f32 %v2472_v18, %v164_v27  ;;  %v395_v45 = vand.u32 4294901760, %v394_v34 }
  0x10   :  { %v110_v41 = vsub.f32 %v2482_v23, %v2497_v31  ;;  %240 = vmatpush.msra.mxu3 %v2449_v9  ;;  %v160_v44 = vand.u32 4294901760, %v159_v33  ;;  %v2525_v46 = vand.u32 4294901760, %v2506_v35  ;;  %v400_v47 = vsub.f32 %v2492_v29, %v399_v36 }
  0x11   :  { %275 = vmatpush.msrb.mxu0 %v146_v22  ;;  %149 = vmatpush.msra.mxu1 %v148_v40  ;;  %v85_v50 = vsel %vm77_vm0, %v59_v38, 0  ;;  %v352_v51 = vand.u32 4294901760, %v70_v39  ;;  %v166_v54 = vand.u32 4294901760, %v165_v43  ;;  %v404_v56 = vsub.f32 %v72_v37, %v350_v49  ;;  %v594_v43 = vld [vmem:[%s4004_s3 + $0x38] sm:$0xff] }
  0x12   :  { %v2530_v48 = vand.u32 4294901760, %v110_v41  ;;  %204 = vmatpush.msra.mxu2 %v2472_v18  ;;  %244 = vmatmul.f32.vlgmr.msra.gmra.mxu3 %v2497_v31  ;;  %v401_v52 = vand.u32 4294901760, %v400_v47  ;;  %v2536_v53 = vand.u32 4294901760, %v85_v50  ;;  %v118_v55 = vsub.f32 %v2506_v35, %v2525_v46  ;;  %v596_v18 = vld [vmem:[%s4004_s3 + $0x48] sm:$0xff] }
  0x13   :  { %207 = vmatmul.f32.vlgmr.msra.gmra.mxu2 %v2482_v23  ;;  %155 = vmatpush.msra.mxu1 %v154_v42  ;;  %v410_v57 = vsub.f32 %v70_v39, %v352_v51  ;;  %v405_v59 = vand.u32 4294901760, %v404_v56  ;;  %v2592_v10 = vand.u32 4294901760, %v600_v7  ;;  %v2606_v15 = vand.u32 4294901760, %v598_v12 }
  0x14   :  { %112 = vmatmul.f32.vlgmr.msra.gmra.mxu0 %v2530_v48  ;;  %347 = vmatpush.msrb.mxu2 %v2452_v11  ;;  %v2543_v58 = vsub.f32 %v85_v50, %v2536_v53  ;;  %v119_v61 = vand.u32 4294901760, %v118_v55  ;;  %v2608_v16 = vand.u32 4294901760, %v597_v13  ;;  %v2693_v55 = vand.u32 4294901760, %v594_v43 }
  0x15   :  { %396 = vmatpush.msrb.mxu3 %v395_v45  ;;  %161 = vmatpush.msra.mxu1 %v160_v44  ;;  %v411_v60 = vand.u32 4294901760, %v410_v57  ;;  %v406_v63 = vsub.f32 %v404_v56, %v405_v59  ;;  %v2624_v22 = vsub.f32 %v600_v7, %v2592_v10  ;;  %v593_v44 = vld [vmem:[%s4004_s3 + $0x30] sm:$0xff]  ;;  %v592_v45 = vld [vmem:[%s4004_s3 + $0x28] sm:$0xff] }
  0x16   :  { %279 = vmatpush.msrb.mxu0 %v152_v24  ;;  %349 = vmatpush.msrb.mxu2 %v2478_v21  ;;  %v2547_v62 = vand.u32 4294901760, %v2543_v58  ;;  %v2627_v24 = vand.u32 4294901760, %v596_v18 }
  0x17   :  { %402 = vmatpush.msrb.mxu3 %v401_v52  ;;  %167 = vmatpush.msra.mxu1 %v166_v54  ;;  %v412_v0 = vsub.f32 %v410_v57, %v411_v60  ;;  %v407_v1 = vand.u32 4294901760, %v406_v63  ;;  %v690_v33 = vand.u32 4294901760, %v2624_v22  ;;  %v591_v52 = vld [vmem:[%s4004_s3 + $0x20] sm:$0xff] }
  0x18   :  { %283 = vmatpush.msrb.mxu0 %v158_v25  ;;  %169 = vmatmul.f32.vlgmr.msra.gmra.mxu1 %v2469_v17  ;;  %v126_v6 = vsub.f32 %v2543_v58, %v2547_v62  ;;  %v2650_v37 = vsub.f32 %v596_v18, %v2627_v24 }
  0x19   :  { %351 = vmatpush.msrb.mxu2 %v350_v49  ;;  %314 = vmatpush.msrb.mxu1 %v2434_v3  ;;  %v413_v2 = vand.u32 4294901760, %v412_v0  ;;  %v691_v40 = vsub.f32 %v2624_v22, %v690_v33  ;;  %v2715_v0 = vand.u32 4294901760, %v591_v52 }
  0x1a   :  { %287 = vmatpush.msrb.mxu0 %v164_v27  ;;  %250 = vmatmul.f32.gmra.mxu3 %v2525_v46  ;;  %v127_v3 = vand.u32 4294901760, %v126_v6  ;;  %v2637_v27 = vsub.f32 %v597_v13, %v2608_v16 }
  0x1b   :  { %212 = vmatmul.f32.gmra.mxu2 %v2506_v35  ;;  %316 = vmatpush.msrb.mxu1 %v2436_v4  ;;  %v602_v4 = vld [vmem:[%s4004_s3 + $0x78] sm:$0xff]  ;;  %v692_v54 = vand.u32 4294901760, %v691_v40 }
  0x1c   :  { %120 = vmatmul.f32.gmra.mxu0 %v119_v61  ;;  %408 = vmatpush.msrb.mxu3 %v407_v1  ;;  %v2588_v8 = vand.u32 4294901760, %v602_v4  ;;  %v708_v41 = vand.u32 4294901760, %v2637_v27 }
  0x1d   :  { %353 = vmatpush.msrb.mxu2 %v352_v51  ;;  %318 = vmatpush.msrb.mxu1 %v2438_v5  ;;  %v601_v5 = vld [vmem:[%s4004_s3 + $0x70] sm:$0xff] }
  0x1e   :  { %414 = vmatpush.msrb.mxu3 %v413_v2  ;;  %442 = vmatpush.msra.mxu0 %v2475_v19  ;;  %v595_v19 = vld [vmem:[%s4004_s3 + $0x40] sm:$0xff]  ;;  %v2618_v20 = vsub.f32 %v602_v4, %v2588_v8 }
  0x1f   :  { %522 = vmatpush.msra.mxu2 %v393_v26  ;;  %320 = vmatpush.msrb.mxu1 %v2449_v9  ;;  %v2590_v9 = vand.u32 4294901760, %v601_v5  ;;  %v2634_v26 = vsub.f32 %v598_v12, %v2606_v15  ;;  %v2737_v12 = vsub.f32 %v591_v52, %v2715_v0 }
  0x20   :  { %561 = vmatpush.msra.mxu3 %v2452_v11  ;;  %173 = vmatmul.f32.gmra.mxu1 %v2489_v28  ;;  %v678_v30 = vand.u32 4294901760, %v2618_v20 }
  0x21   :  { %526 = vmatpush.msra.mxu2 %v399_v36  ;;  %481 = vmatpush.msra.mxu1 %v2452_v11  ;;  %v599_v11 = vld [vmem:[%s4004_s3 + $0x60] sm:$0xff]  ;;  %v702_v36 = vand.u32 4294901760, %v2634_v26 }
  0x22   :  { %445 = vmatpush.msra.mxu0 %v2492_v29  ;;  %256 = vmatmul.f32.gmra.mxu3 %v2547_v62  ;;  %v2604_v14 = vand.u32 4294901760, %v599_v11  ;;  %v2639_v29 = vand.u32 4294901760, %v595_v19  ;;  %v679_v38 = vsub.f32 %v2618_v20, %v678_v30 }
  0x23   :  { %217 = vmatmul.f32.gmra.mxu2 %v2543_v58  ;;  %563 = vmatpush.msra.mxu3 %v2478_v21  ;;  %v703_v50 = vsub.f32 %v2634_v26, %v702_v36 }
  0x24   :  { %128 = vmatmul.f32.gmra.mxu0 %v127_v3  ;;  %483 = vmatpush.msra.mxu1 %v2478_v21  ;;  %v2621_v21 = vsub.f32 %v601_v5, %v2590_v9  ;;  %v2630_v25 = vsub.f32 %v599_v11, %v2604_v14  ;;  %v2667_v42 = vsub.f32 %v595_v19, %v2639_v29  ;;  %v680_v47 = vand.u32 4294901760, %v679_v38 }
  0x25   :  { %530 = vmatpush.msra.mxu2 %v405_v59  ;;  %448 = vmatpush.msra.mxu0 %v404_v56  ;;  %v2695_v56 = vand.u32 4294901760, %v593_v44  ;;  %v704_v2 = vand.u32 4294901760, %v703_v50 }
  0x26   :  { %565 = vmatpush.msra.mxu3 %v350_v49  ;;  %485 = vmatpush.msra.mxu1 %v350_v49  ;;  %v684_v32 = vand.u32 4294901760, %v2621_v21  ;;  %v696_v34 = vand.u32 4294901760, %v2630_v25  ;;  %v720_v59 = vand.u32 4294901760, %v2667_v42 }
  0x27   :  { %534 = vmatpush.msra.mxu2 %v411_v60  ;;  %451 = vmatpush.msra.mxu0 %v410_v57  ;;  %v2697_v57 = vand.u32 4294901760, %v592_v45  ;;  %v2713_v63 = vsub.f32 %v593_v44, %v2695_v56 }
  0x28   :  { %567 = vmatpush.msra.mxu3 %v352_v51  ;;  %177 = vmatmul.f32.gmra.mxu1 %v2536_v53  ;;  %v685_v39 = vsub.f32 %v2621_v21, %v684_v32  ;;  %v697_v49 = vsub.f32 %v2630_v25, %v696_v34  ;;  %v721_v7 = vsub.f32 %v2667_v42, %v720_v59 }
  0x29   :  { %487 = vmatpush.msra.mxu1 %v352_v51  ;;  %v714_v51 = vand.u32 4294901760, %v2650_v37  ;;  %v732_v11 = vand.u32 4294901760, %v2713_v63 }
  0x2a   :  { %416 = vmatmul.f32.vlgmr.msrb.gmra.mxu3 %v2469_v17  ;;  %v698_v60 = vand.u32 4294901760, %v697_v49  ;;  %v722_v38 = vand.u32 4294901760, %v721_v7  ;;  %v588_v49 = vld [vmem:[%s4004_s3 + $0x8] sm:$0xff] }
  0x2b   :  { %359 = vmatmul.f32.vlgmr.msrb.gmra.mxu2 %v2530_v48  ;;  %850 = vmatpush.msrb.mxu3 %v2588_v8  ;;  %v686_v48 = vand.u32 4294901760, %v685_v39  ;;  %v715_v1 = vsub.f32 %v2650_v37, %v714_v51  ;;  %v2800_v52 = vand.u32 4294901760, %v588_v49 }
  0x2c   :  { %289 = vmatmul.f32.vlgmr.msrb.gmra.mxu0 %v2469_v17  ;;  %787 = vmatpush.msrb.mxu2 %v2618_v20 }
  0x2d   :  { %620 = vmatpush.msrb.mxu0 %v2588_v8  ;;  %852 = vmatpush.msrb.mxu3 %v2590_v9 }
  0x2e   :  { %790 = vmatpush.msrb.mxu2 %v2621_v21 }
  0x2f   :  { %622 = vmatpush.msrb.mxu0 %v2590_v9  ;;  %854 = vmatpush.msrb.mxu3 %v2592_v10 }
  0x30   :  { %322 = vmatmul.f32.vlgmr.msrb.gmra.mxu1 %v2469_v17  ;;  %793 = vmatpush.msrb.mxu2 %v2624_v22 }
  0x31   :  { %624 = vmatpush.msrb.mxu0 %v2592_v10  ;;  %856 = vmatpush.msrb.mxu3 %v2604_v14 }
  0x32   :  { %420 = vmatmul.f32.gmra.mxu3 %v2489_v28  ;;  %681 = vmatpush.msrb.mxu1 %v680_v47 }
  0x33   :  { %367 = vmatmul.f32.gmra.mxu2 %v119_v61  ;;  %858 = vmatpush.msrb.mxu3 %v2606_v15  ;;  %v2710_v61 = vsub.f32 %v594_v43, %v2693_v55 }
  0x34   :  { %293 = vmatmul.f32.gmra.mxu0 %v2489_v28  ;;  %687 = vmatpush.msrb.mxu1 %v686_v48 }
  0x35   :  { %626 = vmatpush.msrb.mxu0 %v2604_v14  ;;  %796 = vmatpush.msrb.mxu2 %v2630_v25  ;;  %v726_v6 = vand.u32 4294901760, %v2710_v61  ;;  %v614_v25 = vld [vmem:[%s4004_s3 + $0xd8] sm:$0xff] }
  0x36   :  { %860 = vmatpush.msrb.mxu3 %v2608_v16  ;;  %693 = vmatpush.msrb.mxu1 %v692_v54  ;;  %v587_v54 = vld [vmem:[%s4004_s3] sm:$0xff] }
  0x37   :  { %628 = vmatpush.msrb.mxu0 %v2606_v15  ;;  %799 = vmatpush.msrb.mxu2 %v2634_v26  ;;  %v727_v13 = vsub.f32 %v2710_v61, %v726_v6  ;;  %v613_v26 = vld [vmem:[%s4004_s3 + $0xd0] sm:$0xff] }
  0x38   :  { %326 = vmatmul.f32.gmra.mxu1 %v2489_v28  ;;  %862 = vmatpush.msrb.mxu3 %v2627_v24 }
  0x39   :  { %699 = vmatpush.msrb.mxu1 %v698_v60  ;;  %630 = vmatpush.msrb.mxu0 %v2608_v16  ;;  %v728_v39 = vand.u32 4294901760, %v727_v13  ;;  %v2811_v60 = vand.u32 4294901760, %v587_v54 }
  0x3a   :  { %424 = vmatmul.f32.gmra.mxu3 %v2536_v53  ;;  %802 = vmatpush.msrb.mxu2 %v2637_v27 }
  0x3b   :  { %375 = vmatmul.f32.gmra.mxu2 %v127_v3  ;;  %v2725_v3 = vsub.f32 %v592_v45, %v2697_v57  ;;  %705 = vmatpush.msrb.mxu1 %v704_v2 }
  0x3c   :  { %297 = vmatmul.f32.gmra.mxu0 %v2536_v53  ;;  %864 = vmatpush.msrb.mxu3 %v2639_v29 }
  0x3d   :  { %v738_v18 = vand.u32 4294901760, %v2725_v3  ;;  %632 = vmatpush.msrb.mxu0 %v2627_v24  ;;  %805 = vmatpush.msrb.mxu2 %v2650_v37  ;;  %v611_v37 = vld [vmem:[%s4004_s3 + $0xc0] sm:$0xff] }
  0x3e   :  { %866 = vmatpush.msrb.mxu3 %v2693_v55 }
  0x3f   :  { %v739_v40 = vsub.f32 %v2725_v3, %v738_v18  ;;  %634 = vmatpush.msrb.mxu0 %v2639_v29  ;;  %808 = vmatpush.msrb.mxu2 %v2667_v42  ;;  %v610_v42 = vld [vmem:[%s4004_s3 + $0xb8] sm:$0xff] }
  0x40   :  { %330 = vmatmul.f32.gmra.mxu1 %v2536_v53  ;;  %868 = vmatpush.msrb.mxu3 %v2695_v56 }
  0x41   :  { %v740_v47 = vand.u32 4294901760, %v739_v40  ;;  %636 = vmatpush.msrb.mxu0 %v2693_v55  ;;  %811 = vmatpush.msrb.mxu2 %v2710_v61  ;;  %v609_v61 = vld [vmem:[%s4004_s3 + $0xb0] sm:$0xff] }
  0x42   :  { %569 = vmatmul.f32.vlgmr.msra.gmra.mxu3 %v2469_v17 }
  0x43   :  { %536 = vmatmul.f32.vlgmr.msra.gmra.mxu2 %v2469_v17  ;;  %v709_v17 = vsub.f32 %v2637_v27, %v708_v41  ;;  %870 = vmatpush.msrb.mxu3 %v2697_v57  ;;  %v612_v27 = vld [vmem:[%s4004_s3 + $0xc8] sm:$0xff] }
  0x44   :  { %454 = vmatmul.f32.vlgmr.msra.gmra.mxu0 %v2482_v23  ;;  %v590_v23 = vld [vmem:[%s4004_s3 + $0x18] sm:$0xff]  ;;  %814 = vmatpush.msrb.mxu2 %v2713_v63 }
  0x45   :  { %v2727_v4 = vand.u32 4294901760, %v590_v23  ;;  %v710_v5 = vand.u32 4294901760, %v709_v17  ;;  %638 = vmatpush.msrb.mxu0 %v2695_v56  ;;  %872 = vmatpush.msrb.mxu3 %v2715_v0 }
  0x46   :  { %817 = vmatpush.msrb.mxu2 %v2725_v3 }
  0x47   :  { %v2747_v19 = vsub.f32 %v590_v23, %v2727_v4  ;;  %711 = vmatpush.msrb.mxu1 %v710_v5  ;;  %640 = vmatpush.msrb.mxu0 %v2697_v57  ;;  %v2809_v23 = vsub.f32 %v588_v49, %v2800_v52  ;;  %v2821_v5 = vsub.f32 %v587_v54, %v2811_v60 }
  0x48   :  { %491 = vmatmul.f32.vlgmr.msra.gmra.mxu1 %v2497_v31  ;;  %v716_v31 = vand.u32 4294901760, %v715_v1  ;;  %874 = vmatpush.msrb.mxu3 %v2727_v4 }
  0x49   :  { %v750_v43 = vand.u32 4294901760, %v2747_v19  ;;  %642 = vmatpush.msrb.mxu0 %v2715_v0  ;;  %820 = vmatpush.msrb.mxu2 %v2737_v12  ;;  %v762_v2 = vand.u32 4294901760, %v2809_v23  ;;  %v768_v13 = vand.u32 4294901760, %v2821_v5 }
  0x4a   :  { %573 = vmatmul.f32.gmra.mxu3 %v2489_v28  ;;  %717 = vmatpush.msrb.mxu1 %v716_v31 }
  0x4b   :  { %540 = vmatmul.f32.gmra.mxu2 %v2489_v28  ;;  %v733_v28 = vsub.f32 %v2713_v63, %v732_v11  ;;  %644 = vmatpush.msrb.mxu0 %v2727_v4  ;;  %v763_v31 = vsub.f32 %v2809_v23, %v762_v2  ;;  %v769_v40 = vsub.f32 %v2821_v5, %v768_v13  ;;  %v608_v63 = vld [vmem:[%s4004_s3 + $0xa8] sm:$0xff] }
  0x4c   :  { %459 = vmatmul.f32.gmra.mxu0 %v2506_v35  ;;  %v744_v35 = vand.u32 4294901760, %v2737_v12  ;;  %723 = vmatpush.msrb.mxu1 %v722_v38  ;;  %v618_v38 = vld [vmem:[%s4004_s3 + $0xf8] sm:$0xff] }
  0x4d   :  { %v734_v44 = vand.u32 4294901760, %v733_v28  ;;  %823 = vmatpush.msrb.mxu2 %v2747_v19  ;;  %v2836_v28 = vand.u32 4294901760, %v618_v38 }
  0x4e   :  { %v745_v45 = vsub.f32 %v2737_v12, %v744_v35  ;;  %729 = vmatpush.msrb.mxu1 %v728_v39  ;;  %v764_v39 = vand.u32 4294901760, %v763_v31  ;;  %v2906_v31 = vand.u32 4294901760, %v613_v26 }
  0x50   :  { %497 = vmatmul.f32.gmra.mxu1 %v2525_v46  ;;  %v751_v46 = vsub.f32 %v2747_v19, %v750_v43  ;;  %v746_v48 = vand.u32 4294901760, %v745_v45  ;;  %v2847_v45 = vsub.f32 %v618_v38, %v2836_v28 }
  0x51   :  { %735 = vmatpush.msrb.mxu1 %v734_v44  ;;  %v617_v44 = vld [vmem:[%s4004_s3 + $0xf0] sm:$0xff] }
  0x52   :  { %577 = vmatmul.f32.gmra.mxu3 %v2536_v53  ;;  %v2849_v20 = vand.u32 4294901760, %v617_v44 }
  0x53   :  { %544 = vmatmul.f32.gmra.mxu2 %v2536_v53  ;;  %741 = vmatpush.msrb.mxu1 %v740_v47  ;;  %v752_v53 = vand.u32 4294901760, %v751_v46  ;;  %v616_v47 = vld [vmem:[%s4004_s3 + $0xe8] sm:$0xff]  ;;  %v1081_v46 = vand.u32 4294901760, %v2847_v45 }
  0x54   :  { %464 = vmatmul.f32.gmra.mxu0 %v2543_v58  ;;  %v589_v58 = vld [vmem:[%s4004_s3 + $0x10] sm:$0xff]  ;;  %v2859_v21 = vsub.f32 %v617_v44, %v2849_v20 }
  0x55   :  { %747 = vmatpush.msrb.mxu1 %v746_v48  ;;  %v615_v48 = vld [vmem:[%s4004_s3 + $0xe0] sm:$0xff]  ;;  %v1082_v22 = vsub.f32 %v2847_v45, %v1081_v46 }
  0x57   :  { %753 = vmatpush.msrb.mxu1 %v752_v53 }
  0x58   :  { %503 = vmatmul.f32.gmra.mxu1 %v2547_v62  ;;  %v2792_v62 = vand.u32 4294901760, %v589_v58 }
  0x5a   :  { %v2798_v50 = vsub.f32 %v589_v58, %v2792_v62  ;;  %876 = vmatpush.msrb.mxu3 %v2792_v62  ;;  %646 = vmatpush.msrb.mxu0 %v2792_v62  ;;  %v2877_v58 = vand.u32 4294901760, %v615_v48 }
  0x5c   :  { %v756_v17 = vand.u32 4294901760, %v2798_v50  ;;  %878 = vmatpush.msrb.mxu3 %v2800_v52  ;;  %826 = vmatpush.msrb.mxu2 %v2798_v50  ;;  %v2891_v54 = vsub.f32 %v615_v48, %v2877_v58 }
  0x5d   :  { %648 = vmatpush.msrb.mxu0 %v2800_v52 }
  0x5e   :  { %v757_v1 = vsub.f32 %v2798_v50, %v756_v17  ;;  %880 = vmatpush.msrb.mxu3 %v2811_v60  ;;  %829 = vmatpush.msrb.mxu2 %v2809_v23 }
  0x5f   :  { %650 = vmatpush.msrb.mxu0 %v2811_v60 }
  0x60   :  { %v758_v7 = vand.u32 4294901760, %v757_v1  ;;  %832 = vmatpush.msrb.mxu2 %v2821_v5  ;;  %v2894_v1 = vand.u32 4294901760, %v614_v25 }
  0x61   :  { %903 = vmatpush.msra.mxu0 %v678_v30  ;;  %v770_v30 = vand.u32 4294901760, %v769_v40  ;;  %v2924_v40 = vand.u32 4294901760, %v612_v27 }
  0x62   :  { %759 = vmatpush.msrb.mxu1 %v758_v7  ;;  %1023 = vmatpush.msra.mxu2 %v2836_v28  ;;  %v1099_v7 = vand.u32 4294901760, %v2891_v54  ;;  %v2909_v38 = vsub.f32 %v614_v25, %v2894_v1  ;;  %v2957_v25 = vand.u32 4294901760, %v610_v42 }
  0x63   :  { %907 = vmatpush.msra.mxu0 %v684_v32  ;;  %v2861_v32 = vand.u32 4294901760, %v616_v47 }
  0x64   :  { %765 = vmatpush.msrb.mxu1 %v764_v39  ;;  %1025 = vmatpush.msra.mxu2 %v2849_v20  ;;  %v2922_v39 = vsub.f32 %v613_v26, %v2906_v31  ;;  %v1105_v44 = vand.u32 4294901760, %v2909_v38  ;;  %v2971_v26 = vsub.f32 %v610_v42, %v2957_v25 }
  0x65   :  { %911 = vmatpush.msra.mxu0 %v690_v33  ;;  %v1087_v33 = vand.u32 4294901760, %v2859_v21  ;;  %v2875_v53 = vsub.f32 %v616_v47, %v2861_v32  ;;  %v2938_v47 = vand.u32 4294901760, %v611_v37 }
  0x66   :  { %771 = vmatpush.msrb.mxu1 %v770_v30  ;;  %1027 = vmatpush.msra.mxu2 %v2861_v32  ;;  %v2936_v30 = vsub.f32 %v612_v27, %v2924_v40  ;;  %v1106_v48 = vsub.f32 %v2909_v38, %v1105_v44  ;;  %v2984_v27 = vand.u32 4294901760, %v608_v63 }
  0x67   :  { %915 = vmatpush.msra.mxu0 %v696_v34  ;;  %v1088_v34 = vsub.f32 %v2859_v21, %v1087_v33  ;;  %v1093_v49 = vand.u32 4294901760, %v2875_v53 }
  0x68   :  { %978 = vmatpush.msra.mxu1 %v2588_v8  ;;  %v1083_v8 = vand.u32 4294901760, %v1082_v22  ;;  %1029 = vmatpush.msra.mxu2 %v2877_v58  ;;  %v2955_v22 = vsub.f32 %v611_v37, %v2938_v47  ;;  %v3000_v3 = vsub.f32 %v608_v63, %v2984_v27 }
  0x69   :  { %919 = vmatpush.msra.mxu0 %v702_v36  ;;  %v1094_v36 = vsub.f32 %v2875_v53, %v1093_v49 }
  0x6a   :  { %980 = vmatpush.msra.mxu1 %v2590_v9  ;;  %1084 = vmatpush.msra.mxu3 %v1083_v8  ;;  %v1089_v9 = vand.u32 4294901760, %v1088_v34  ;;  %v1107_v8 = vand.u32 4294901760, %v1106_v48  ;;  %v4018_v34 = vand.u32 4294901760, %v2955_v22  ;;  %v4015_v42 = vand.u32 4294901760, %v3000_v3 }
  0x6b   :  { %923 = vmatpush.msra.mxu0 %v708_v41  ;;  %1031 = vmatpush.msra.mxu2 %v2894_v1  ;;  %v1100_v41 = vsub.f32 %v2891_v54, %v1099_v7 }
  0x6c   :  { %982 = vmatpush.msra.mxu1 %v2592_v10  ;;  %1090 = vmatpush.msra.mxu3 %v1089_v9  ;;  %v1095_v10 = vand.u32 4294901760, %v1094_v36  ;;  %v2973_v9 = vand.u32 4294901760, %v609_v61  ;;  %v4017_v36 = vand.u32 4294901760, %v2971_v26 }
  0x6d   :  { %927 = vmatpush.msra.mxu0 %v714_v51  ;;  %1033 = vmatpush.msra.mxu2 %v2906_v31  ;;  %v1111_v51 = vand.u32 4294901760, %v2922_v39 }
  0x6e   :  { %984 = vmatpush.msra.mxu1 %v2604_v14  ;;  %1096 = vmatpush.msra.mxu3 %v1095_v10  ;;  %v1101_v14 = vand.u32 4294901760, %v1100_v41  ;;  %v2989_v10 = vsub.f32 %v609_v61, %v2973_v9  ;;  %v1130_v37 = vsub.f32 %v2971_v26, %v4017_v36 }
  0x6f   :  { %931 = vmatpush.msra.mxu0 %v720_v59  ;;  %1035 = vmatpush.msra.mxu2 %v2924_v40  ;;  %v1117_v59 = vand.u32 4294901760, %v2936_v30 }
  0x70   :  { %986 = vmatpush.msra.mxu1 %v2606_v15  ;;  %1102 = vmatpush.msra.mxu3 %v1101_v14  ;;  %v1112_v15 = vsub.f32 %v2922_v39, %v1111_v51  ;;  %v4016_v14 = vand.u32 4294901760, %v2989_v10  ;;  %v1131_v48 = vand.u32 4294901760, %v1130_v37 }
  0x71   :  { %935 = vmatpush.msra.mxu0 %v726_v6  ;;  %1037 = vmatpush.msra.mxu2 %v2938_v47  ;;  %v1118_v6 = vsub.f32 %v2936_v30, %v1117_v59 }
  0x72   :  { %988 = vmatpush.msra.mxu1 %v2608_v16  ;;  %v1113_v16 = vand.u32 4294901760, %v1112_v15  ;;  %1108 = vmatpush.msra.mxu3 %v1107_v8  ;;  %v1136_v12 = vsub.f32 %v2989_v10, %v4016_v14 }
  0x73   :  { %939 = vmatpush.msra.mxu0 %v732_v11  ;;  %1039 = vmatpush.msra.mxu2 %v2957_v25  ;;  %v1124_v11 = vsub.f32 %v2955_v22, %v4018_v34  ;;  %v3103_v34 = vld [vmem:[%s4002_s1 + $0x8] sm:$0xff] }
  0x74   :  { %990 = vmatpush.msra.mxu1 %v2627_v24  ;;  %v1119_v24 = vand.u32 4294901760, %v1118_v6  ;;  %1114 = vmatpush.msra.mxu3 %v1113_v16  ;;  %v1137_v16 = vand.u32 4294901760, %v1136_v12 }
  0x75   :  { %943 = vmatpush.msra.mxu0 %v738_v18  ;;  %1041 = vmatpush.msra.mxu2 %v2973_v9  ;;  %v1125_v41 = vand.u32 4294901760, %v1124_v11 }
  0x76   :  { %992 = vmatpush.msra.mxu1 %v2639_v29  ;;  %v607_v29 = vld [vmem:[%s4004_s3 + $0xa0] sm:$0xff]  ;;  %1120 = vmatpush.msra.mxu3 %v1119_v24 }
  0x77   :  { %v3002_v18 = vand.u32 4294901760, %v607_v29  ;;  %947 = vmatpush.msra.mxu0 %v744_v35  ;;  %1043 = vmatpush.msra.mxu2 %v2984_v27  ;;  %v1142_v35 = vsub.f32 %v3000_v3, %v4015_v42 }
  0x78   :  { %994 = vmatpush.msra.mxu1 %v2693_v55  ;;  %v606_v55 = vld [vmem:[%s4004_s3 + $0x98] sm:$0xff]  ;;  %1126 = vmatpush.msra.mxu3 %v1125_v41 }
  0x79   :  { %v3014_v15 = vsub.f32 %v607_v29, %v3002_v18  ;;  %v3016_v8 = vand.u32 4294901760, %v606_v55  ;;  %951 = vmatpush.msra.mxu0 %v750_v43  ;;  %1045 = vmatpush.msra.mxu2 %v3002_v18  ;;  %v1143_v6 = vand.u32 4294901760, %v1142_v35 }
  0x7a   :  { %996 = vmatpush.msra.mxu1 %v2695_v56  ;;  %v605_v56 = vld [vmem:[%s4004_s3 + $0x90] sm:$0xff]  ;;  %1132 = vmatpush.msra.mxu3 %v1131_v48 }
  0x7b   :  { %v4013_v19 = vand.u32 4294901760, %v3014_v15  ;;  %v3033_v43 = vsub.f32 %v606_v55, %v3016_v8  ;;  %v3035_v61 = vand.u32 4294901760, %v605_v56  ;;  %955 = vmatpush.msra.mxu0 %v756_v17  ;;  %1047 = vmatpush.msra.mxu2 %v3016_v8 }
  0x7c   :  { %998 = vmatpush.msra.mxu1 %v2697_v57  ;;  %v604_v57 = vld [vmem:[%s4004_s3 + $0x88] sm:$0xff]  ;;  %1138 = vmatpush.msra.mxu3 %v1137_v16 }
  0x7d   :  { %v1148_v63 = vsub.f32 %v3014_v15, %v4013_v19  ;;  %v4012_v24 = vand.u32 4294901760, %v3033_v43  ;;  %v3049_v50 = vsub.f32 %v605_v56, %v3035_v61  ;;  %959 = vmatpush.msra.mxu0 %v762_v2  ;;  %v3053_v17 = vand.u32 4294901760, %v604_v57  ;;  %1049 = vmatpush.msra.mxu2 %v3035_v61 }
  0x7e   :  { %1000 = vmatpush.msra.mxu1 %v2715_v0  ;;  %v603_v0 = vld [vmem:[%s4004_s3 + $0x80] sm:$0xff]  ;;  %1144 = vmatpush.msra.mxu3 %v1143_v6 }
  0x7f   :  { %v1149_v11 = vand.u32 4294901760, %v1148_v63  ;;  %v1154_v29 = vsub.f32 %v3033_v43, %v4012_v24  ;;  %v4011_v41 = vand.u32 4294901760, %v3049_v50  ;;  %v3064_v23 = vand.u32 4294901760, %v603_v0  ;;  %963 = vmatpush.msra.mxu0 %v768_v13  ;;  %1051 = vmatpush.msra.mxu2 %v3053_v17 }
  0x80   :  { %1002 = vmatpush.msra.mxu1 %v2727_v4  ;;  %v3069_v2 = vsub.f32 %v604_v57, %v3053_v17 }
  0x81   :  { %v1155_v4 = vand.u32 4294901760, %v1154_v29  ;;  %v1160_v55 = vsub.f32 %v3049_v50, %v4011_v41  ;;  %v3077_v48 = vsub.f32 %v603_v0, %v3064_v23  ;;  %1150 = vmatpush.msra.mxu3 %v1149_v11  ;;  %1053 = vmatpush.msra.mxu2 %v3064_v23 }
  0x82   :  { %1004 = vmatpush.msra.mxu1 %v2792_v62  ;;  %v4010_v5 = vand.u32 4294901760, %v3069_v2 }
  0x83   :  { %v1161_v13 = vand.u32 4294901760, %v1160_v55  ;;  %v4014_v12 = vand.u32 4294901760, %v3077_v48  ;;  %1156 = vmatpush.msra.mxu3 %v1155_v4 }
  0x84   :  { %1006 = vmatpush.msra.mxu1 %v2800_v52  ;;  %v1166_v62 = vsub.f32 %v3069_v2, %v4010_v5 }
  0x85   :  { %v1172_v56 = vsub.f32 %v3077_v48, %v4014_v12  ;;  %1162 = vmatpush.msra.mxu3 %v1161_v13  ;;  %v3093_v13 = vld [vmem:[%s4002_s1] sm:$0xff] }
  0x86   :  { %1008 = vmatpush.msra.mxu1 %v2811_v60  ;;  %v1167_v57 = vand.u32 4294901760, %v1166_v62 }
  0x87   :  { %v1173_v52 = vand.u32 4294901760, %v1172_v56 }
  0x88   :  { %1168 = vmatpush.msra.mxu3 %v1167_v57 }
  0x8a   :  { %1174 = vmatpush.msra.mxu3 %v1173_v52  ;;  %v63_v52 = vunpack.c.l.bf16 %v3093_v13 }
  0x91   :  { %v113_v37 = vpop.f32.mrf.mxu0 }
  0x95   :  { %v170_v35 = vpop.f32.mrf.mxu1  ;;  %v245_v6 = vpop.f32.mrf.mxu3 }
  0x96   :  { %v208_v16 = vpop.f32.mrf.mxu2  ;;  %v171_v55 = vadd.f32 %v170_v35, %v113_v37 }
  0x98   :  { %v209_v41 = vadd.f32 %v208_v16, %v171_v55 }
  0x99   :  { %v121_v63 = vpop.f32.mrf.mxu0 }
  0x9a   :  { %v246_v62 = vadd.f32 %v245_v6, %v209_v41 }
  0x9d   :  { %v174_v0 = vpop.f32.mrf.mxu1  ;;  %v251_v29 = vpop.f32.mrf.mxu3 }
  0x9e   :  { %v213_v11 = vpop.f32.mrf.mxu2  ;;  %v175_v56 = vadd.f32 %v174_v0, %v121_v63 }
  0xa0   :  { %v214_v14 = vadd.f32 %v213_v11, %v175_v56 }
  0xa1   :  { %v129_v4 = vpop.f32.mrf.mxu0 }
  0xa2   :  { %v252_v41 = vadd.f32 %v251_v29, %v214_v14 }
  0xa5   :  { %v178_v5 = vpop.f32.mrf.mxu1  ;;  %v257_v24 = vpop.f32.mrf.mxu3 }
  0xa6   :  { %v218_v60 = vpop.f32.mrf.mxu2  ;;  %v179_v6 = vadd.f32 %v178_v5, %v129_v4 }
  0xa8   :  { %v219_v56 = vadd.f32 %v218_v60, %v179_v6  ;;  %v3125_v60 = vld [vmem:[%s4002_s1 + $0x10] sm:$0xff] }
  0xa9   :  { %v290_v19 = vpop.f32.mrf.mxu0 }
  0xaa   :  { %v291_v57 = vadd.f32 %v290_v19, %v246_v62 }
  0xad   :  { %v323_v12 = vpop.f32.mrf.mxu1  ;;  %v417_v35 = vpop.f32.mrf.mxu3 }
  0xae   :  { %v3096_v42 = vpop.f32.mrf.mxu2  ;;  %v324_v37 = vadd.f32 %v323_v12, %v291_v57  ;;  %v65_v12 = vunpack.c.l.bf16 %v3103_v34 }
  0xb0   :  { %v581_v36 = vmul.f32 %v324_v37, %v63_v52  ;;  %v3098_v16 = vsub.f32 %v63_v52, %v324_v37  ;;  %v258_v37 = vadd.f32 %v257_v24, %v219_v56 }
  0xb1   :  { %v294_v55 = vpop.f32.mrf.mxu0 }
  0xb2   :  { %v3105_v19 = vand.u32 4294901760, %v581_v36  ;;  %v295_v0 = vadd.f32 %v294_v55, %v252_v41 }
  0xb4   :  { %v652_v63 = vsub.f32 %v581_v36, %v3105_v19  ;;  %773 = vmatmul.f32.vlgmr.msrb.gmra.mxu1 %v3105_v19 }
  0xb5   :  { %1253 = vmatpush.msrb.mxu1 %v2836_v28  ;;  %v327_v11 = vpop.f32.mrf.mxu1  ;;  %v3113_v52 = vpop.f32.mrf.mxu3 }
  0xb6   :  { %v3111_v62 = vpop.f32.mrf.mxu2  ;;  %v328_v57 = vadd.f32 %v327_v11, %v295_v0  ;;  %835 = vmatmul.f32.vlgmr.msrb.gmra.mxu2 %v652_v63  ;;  %v653_v14 = vand.u32 4294901760, %v652_v63 }
  0xb7   :  { %1255 = vmatpush.msrb.mxu1 %v2849_v20  ;;  %1306 = vmatpush.msrb.mxu2 %v1081_v46 }
  0xb8   :  { %v583_v36 = vmul.f32 %v328_v57, %v65_v12  ;;  %v3118_v5 = vsub.f32 %v65_v12, %v328_v57  ;;  %884 = vmatmul.f32.vlgmr.msrb.gmra.mxu3 %v653_v14  ;;  %v654_v4 = vsub.f32 %v652_v63, %v653_v14 }
  0xb9   :  { %v298_v29 = vpop.f32.mrf.mxu0  ;;  %1257 = vmatpush.msrb.mxu1 %v2861_v32  ;;  %1381 = vmatpush.msrb.mxu3 %v2836_v28  ;;  %v67_v28 = vunpack.c.l.bf16 %v3125_v60 }
  0xba   :  { %v3127_v55 = vand.u32 4294901760, %v583_v36  ;;  %v655_v41 = vand.u32 4294901760, %v654_v4  ;;  %1310 = vmatpush.msrb.mxu2 %v1087_v33  ;;  %v299_v46 = vadd.f32 %v298_v29, %v258_v37 }
  0xbb   :  { %1259 = vmatpush.msrb.mxu1 %v2877_v58  ;;  %1383 = vmatpush.msrb.mxu3 %v2849_v20 }
  0xbc   :  { %656 = vmatmul.f32.vlgmr.msrb.gmra.mxu0 %v655_v41  ;;  %777 = vmatmul.f32.gmra.mxu1 %v3127_v55  ;;  %v660_v6 = vsub.f32 %v583_v36, %v3127_v55 }
  0xbd   :  { %1190 = vmatpush.msrb.mxu0 %v2847_v45  ;;  %1261 = vmatpush.msrb.mxu1 %v2894_v1  ;;  %v331_v24 = vpop.f32.mrf.mxu1  ;;  %v3141_v20 = vpop.f32.mrf.mxu3 }
  0xbe   :  { %v3138_v63 = vpop.f32.mrf.mxu2  ;;  %1385 = vmatpush.msrb.mxu3 %v2861_v32  ;;  %v332_v33 = vadd.f32 %v331_v24, %v299_v46  ;;  %840 = vmatmul.f32.gmra.mxu2 %v660_v6  ;;  %v661_v0 = vand.u32 4294901760, %v660_v6  ;;  %v1452_v32 = vld [vmem:[%s4005_s4 + $0x78] sm:$0xff]  ;;  %v64_v46 = vunpack.c.h.bf16 %v3093_v13 }
  0xbf   :  { %1193 = vmatpush.msrb.mxu0 %v2859_v21  ;;  %1263 = vmatpush.msrb.mxu1 %v2906_v31  ;;  %v418_v21 = vadd.f32 %v417_v35, %v3096_v42  ;;  %v1451_v42 = vld [vmem:[%s4005_s4 + $0x70] sm:$0xff] }
  0xc0   :  { %v585_v12 = vmul.f32 %v332_v33, %v67_v28  ;;  %v3145_v11 = vsub.f32 %v67_v28, %v332_v33  ;;  %1387 = vmatpush.msrb.mxu3 %v2877_v58  ;;  %1314 = vmatpush.msrb.mxu2 %v1093_v49  ;;  %v662_v56 = vsub.f32 %v660_v6, %v661_v0  ;;  %v3162_v49 = vand.u32 4294901760, %v1452_v32 }
  0xc1   :  { %v455_v45 = vpop.f32.mrf.mxu0  ;;  %890 = vmatmul.f32.gmra.mxu3 %v661_v0  ;;  %1196 = vmatpush.msrb.mxu0 %v2875_v53  ;;  %v3182_v4 = vand.u32 4294901760, %v1451_v42 }
  0xc2   :  { %v3155_v57 = vand.u32 4294901760, %v585_v12  ;;  %1265 = vmatpush.msrb.mxu1 %v2924_v40  ;;  %1389 = vmatpush.msrb.mxu3 %v2894_v1  ;;  %v663_v58 = vand.u32 4294901760, %v662_v56  ;;  %v456_v14 = vadd.f32 %v455_v45, %v418_v21  ;;  %v3180_v29 = vsub.f32 %v1452_v32, %v3162_v49 }
  0xc3   :  { %1199 = vmatpush.msrb.mxu0 %v2891_v54  ;;  %1318 = vmatpush.msrb.mxu2 %v1099_v7  ;;  %v3201_v33 = vsub.f32 %v1451_v42, %v3182_v4  ;;  %v66_v42 = vunpack.c.h.bf16 %v3103_v34 }
  0xc4   :  { %1267 = vmatpush.msrb.mxu1 %v2938_v47  ;;  %1391 = vmatpush.msrb.mxu3 %v2906_v31  ;;  %v668_v53 = vsub.f32 %v585_v12, %v3155_v57  ;;  %v1450_v31 = vld [vmem:[%s4005_s4 + $0x68] sm:$0xff]  ;;  %v4036_v24 = vand.u32 4294901760, %v3180_v29 }
  0xc5   :  { %664 = vmatmul.f32.gmra.mxu0 %v663_v58  ;;  %781 = vmatmul.f32.gmra.mxu1 %v3155_v57  ;;  %v492_v1 = vpop.f32.mrf.mxu1  ;;  %v570_v36 = vpop.f32.mrf.mxu3  ;;  %v4034_v21 = vand.u32 4294901760, %v3201_v33 }
  0xc6   :  { %v537_v35 = vpop.f32.mrf.mxu2  ;;  %1202 = vmatpush.msrb.mxu0 %v2909_v38  ;;  %1269 = vmatpush.msrb.mxu1 %v2957_v25  ;;  %v493_v54 = vadd.f32 %v492_v1, %v456_v14  ;;  %v669_v7 = vand.u32 4294901760, %v668_v53  ;;  %v1449_v38 = vld [vmem:[%s4005_s4 + $0x60] sm:$0xff]  ;;  %v1529_v32 = vsub.f32 %v3180_v29, %v4036_v24  ;;  %v4052_v1 = vand.u32 4294901760, %v2971_v26 }
  0xc7   :  { %1322 = vmatpush.msrb.mxu2 %v1105_v44  ;;  %1393 = vmatpush.msrb.mxu3 %v2924_v40  ;;  %v3192_v40 = vand.u32 4294901760, %v1450_v31  ;;  %v422_v44 = vadd.f32 %v3113_v52, %v3111_v62  ;;  %v1448_v52 = vld [vmem:[%s4005_s4 + $0x58] sm:$0xff] }
  0xc8   :  { %845 = vmatmul.f32.gmra.mxu2 %v668_v53  ;;  %1205 = vmatpush.msrb.mxu0 %v2922_v39  ;;  %v538_v41 = vadd.f32 %v537_v35, %v493_v54  ;;  %v670_v28 = vsub.f32 %v668_v53, %v669_v7  ;;  %v3203_v39 = vand.u32 4294901760, %v1449_v38  ;;  %v3231_v14 = vand.u32 4294901760, %v1448_v52 }
  0xc9   :  { %v460_v37 = vpop.f32.mrf.mxu0  ;;  %1271 = vmatpush.msrb.mxu1 %v2973_v9  ;;  %1326 = vmatpush.msrb.mxu2 %v1111_v51  ;;  %v3216_v45 = vsub.f32 %v1450_v31, %v3192_v40 }
  0xca   :  { %1395 = vmatpush.msrb.mxu3 %v2938_v47  ;;  %1208 = vmatpush.msrb.mxu0 %v2936_v30  ;;  %v571_v13 = vadd.f32 %v570_v36, %v538_v41  ;;  %v671_v6 = vand.u32 4294901760, %v670_v28  ;;  %v461_v51 = vadd.f32 %v460_v37, %v422_v44  ;;  %v3229_v58 = vsub.f32 %v1449_v38, %v3203_v39 }
  0xcb   :  { %896 = vmatmul.f32.gmra.mxu3 %v669_v7  ;;  %1273 = vmatpush.msrb.mxu1 %v2984_v27  ;;  %v4032_v54 = vand.u32 4294901760, %v3216_v45  ;;  %v1446_v7 = vld [vmem:[%s4005_s4 + $0x48] sm:$0xff]  ;;  %v426_v36 = vadd.f32 %v3141_v20, %v3138_v63  ;;  %v1530_v37 = vand.u32 4294901760, %v1529_v32  ;;  %v1535_v41 = vsub.f32 %v3201_v33, %v4034_v21  ;;  %v1461_v21 = vld [vmem:[%s4005_s4 + $0xc0] sm:$0xff] }
  0xcc   :  { %1330 = vmatpush.msrb.mxu2 %v1117_v59  ;;  %1397 = vmatpush.msrb.mxu3 %v2957_v25  ;;  %v582_v47 = vmul.f32 %v571_v13, %v64_v46  ;;  %v3208_v62 = vsub.f32 %v64_v46, %v571_v13  ;;  %v4051_v59 = vand.u32 4294901760, %v2955_v22  ;;  %v4031_v63 = vand.u32 4294901760, %v3229_v58 }
  0xcd   :  { %1211 = vmatpush.msrb.mxu0 %v2955_v22  ;;  %1275 = vmatpush.msrb.mxu1 %v3002_v18  ;;  %v498_v0 = vpop.f32.mrf.mxu1  ;;  %v574_v56 = vpop.f32.mrf.mxu3  ;;  %v1447_v22 = vld [vmem:[%s4005_s4 + $0x50] sm:$0xff]  ;;  %v3264_v20 = vsub.f32 %v1448_v52, %v3231_v14  ;;  %v3270_v38 = vand.u32 4294901760, %v1446_v7  ;;  %v4054_v44 = vand.u32 4294901760, %v3000_v3 }
  0xce   :  { %v541_v12 = vpop.f32.mrf.mxu2  ;;  %v3218_v30 = vand.u32 4294901760, %v582_v47  ;;  %1334 = vmatpush.msrb.mxu2 %v4051_v59  ;;  %1399 = vmatpush.msrb.mxu3 %v2973_v9  ;;  %v499_v25 = vadd.f32 %v498_v0, %v461_v51  ;;  %v1541_v51 = vsub.f32 %v3216_v45, %v4032_v54  ;;  %v1536_v59 = vand.u32 4294901760, %v1535_v41 }
  0xcf   :  { %672 = vmatmul.f32.gmra.mxu0 %v671_v6  ;;  %1010 = vmatmul.f32.vlgmr.msra.gmra.mxu1 %v3105_v19  ;;  %v4029_v32 = vand.u32 4294901760, %v3264_v20 }
  0xd0   :  { %v3237_v9 = vsub.f32 %v582_v47, %v3218_v30  ;;  %1214 = vmatpush.msrb.mxu0 %v2971_v26  ;;  %1277 = vmatpush.msrb.mxu1 %v3016_v8  ;;  %v542_v53 = vadd.f32 %v541_v12, %v499_v25  ;;  %v3254_v26 = vand.u32 4294901760, %v1447_v22  ;;  %v1444_v12 = vld [vmem:[%s4005_s4 + $0x38] sm:$0xff] }
  0xd1   :  { %1338 = vmatpush.msrb.mxu2 %v4052_v1  ;;  %1401 = vmatpush.msrb.mxu3 %v2984_v27  ;;  %v465_v35 = vpop.f32.mrf.mxu0  ;;  %v4053_v27 = vand.u32 4294901760, %v2989_v10  ;;  %v3306_v1 = vsub.f32 %v1446_v7, %v3270_v38 }
  0xd2   :  { %v1056_v31 = vand.u32 4294901760, %v3237_v9  ;;  %1217 = vmatpush.msrb.mxu0 %v2989_v10  ;;  %1279 = vmatpush.msrb.mxu1 %v3035_v61  ;;  %v575_v34 = vadd.f32 %v574_v56, %v542_v53  ;;  %v466_v46 = vadd.f32 %v465_v35, %v426_v36  ;;  %v1547_v56 = vsub.f32 %v3229_v58, %v4031_v63 }
  0xd3   :  { %1342 = vmatpush.msrb.mxu2 %v4053_v27  ;;  %1403 = vmatpush.msrb.mxu3 %v3002_v18  ;;  %v1445_v18 = vld [vmem:[%s4005_s4 + $0x40] sm:$0xff]  ;;  %v1542_v35 = vand.u32 4294901760, %v1541_v51  ;;  %v3313_v36 = vand.u32 4294901760, %v1444_v12  ;;  %v1431_v63 = vmul.f32 %v3098_v16, %v3098_v16 }
  0xd4   :  { %1176 = vmatmul.f32.vlgmr.msra.gmra.mxu3 %v3218_v30  ;;  %1220 = vmatpush.msrb.mxu0 %v3000_v3  ;;  %v584_v28 = vmul.f32 %v575_v34, %v66_v42  ;;  %v3268_v10 = vsub.f32 %v66_v42, %v575_v34  ;;  %v1057_v0 = vsub.f32 %v3237_v9, %v1056_v31  ;;  %v3301_v53 = vand.u32 4294901760, %v1445_v18 }
  0xd5   :  { %1281 = vmatpush.msrb.mxu1 %v3053_v17  ;;  %1346 = vmatpush.msrb.mxu2 %v4054_v44  ;;  %v504_v13 = vpop.f32.mrf.mxu1  ;;  %v3289_v3 = vsub.f32 %v1447_v22, %v3254_v26  ;;  %v578_v25 = vpop.f32.mrf.mxu3  ;;  %v68_v42 = vunpack.c.h.bf16 %v3125_v60  ;;  %v4056_v60 = vand.u32 4294901760, %v3033_v43  ;;  %v4022_v44 = vand.u32 4294901760, %v3306_v1 }
  0xd6   :  { %v545_v6 = vpop.f32.mrf.mxu2  ;;  %1405 = vmatpush.msrb.mxu3 %v3016_v8  ;;  %v3282_v47 = vand.u32 4294901760, %v584_v28  ;;  %1223 = vmatpush.msrb.mxu0 %v3014_v15  ;;  %v505_v52 = vadd.f32 %v504_v13, %v466_v46  ;;  %v4055_v8 = vand.u32 4294901760, %v3014_v15  ;;  %v1058_v7 = vand.u32 4294901760, %v1057_v0 }
  0xd7   :  { %1283 = vmatpush.msrb.mxu1 %v3064_v23  ;;  %965 = vmatmul.f32.vlgmr.msra.gmra.mxu0 %v3105_v19  ;;  %v4024_v27 = vand.u32 4294901760, %v3289_v3  ;;  %v1548_v19 = vand.u32 4294901760, %v1547_v56  ;;  %v3327_v41 = vsub.f32 %v1445_v18, %v3301_v53  ;;  %v4057_v46 = vand.u32 4294901760, %v3049_v50  ;;  %v1440_v56 = vld [vmem:[%s4005_s4 + $0x18] sm:$0xff] }
  0xd8   :  { %1350 = vmatpush.msrb.mxu2 %v4055_v8  ;;  %1407 = vmatpush.msrb.mxu3 %v3035_v61  ;;  %v546_v22 = vadd.f32 %v545_v6, %v505_v52  ;;  %v3309_v15 = vsub.f32 %v584_v28, %v3282_v47  ;;  %v1443_v61 = vld [vmem:[%s4005_s4 + $0x30] sm:$0xff]  ;;  %v3343_v6 = vsub.f32 %v1444_v12, %v3313_v36  ;;  %v1441_v52 = vld [vmem:[%s4005_s4 + $0x20] sm:$0xff]  ;;  %v4059_v8 = vand.u32 4294901760, %v3069_v2 }
  0xd9   :  { %1531 = vmatpush.msra.mxu1 %v1530_v37  ;;  %1226 = vmatpush.msrb.mxu0 %v3033_v43  ;;  %v1553_v37 = vsub.f32 %v3264_v20, %v4029_v32  ;;  %v1442_v43 = vld [vmem:[%s4005_s4 + $0x28] sm:$0xff]  ;;  %v3338_v13 = vand.u32 4294901760, %v1443_v61  ;;  %v4021_v12 = vand.u32 4294901760, %v3327_v41 }
  0xda   :  { %1014 = vmatmul.f32.gmra.mxu1 %v3127_v55  ;;  %1354 = vmatpush.msrb.mxu2 %v4056_v60  ;;  %v579_v34 = vadd.f32 %v578_v25, %v546_v22  ;;  %v1064_v18 = vand.u32 4294901760, %v3309_v15  ;;  %v3349_v51 = vand.u32 4294901760, %v1442_v43  ;;  %v4019_v22 = vand.u32 4294901760, %v3343_v6 }
  0xdb   :  { %1409 = vmatpush.msrb.mxu3 %v3053_v17  ;;  %1537 = vmatpush.msra.mxu1 %v1536_v59  ;;  %v1554_v0 = vand.u32 4294901760, %v1553_v37  ;;  %v1565_v59 = vsub.f32 %v3306_v1, %v4022_v44  ;;  %v3365_v25 = vsub.f32 %v1443_v61, %v3338_v13 }
  0xdc   :  { %1229 = vmatpush.msrb.mxu0 %v3049_v50  ;;  %1358 = vmatpush.msrb.mxu2 %v4057_v46  ;;  %v586_v28 = vmul.f32 %v579_v34, %v68_v42  ;;  %v3335_v17 = vsub.f32 %v68_v42, %v579_v34  ;;  %v1559_v50 = vsub.f32 %v3289_v3, %v4024_v27  ;;  %v3376_v42 = vand.u32 4294901760, %v1441_v52 }
  0xdd   :  { %1411 = vmatpush.msrb.mxu3 %v3064_v23  ;;  %1543 = vmatpush.msra.mxu1 %v1542_v35  ;;  %v4060_v35 = vand.u32 4294901760, %v3077_v48  ;;  %v3382_v60 = vsub.f32 %v1442_v43, %v3349_v51  ;;  %v1571_v34 = vsub.f32 %v3327_v41, %v4021_v12  ;;  %v1566_v37 = vand.u32 4294901760, %v1565_v59 }
  0xde   :  { %4058 = vst [vmem:[#allocation5_spill] sm:$0xff] %v3335_v17  ;;  %1059 = vmatmul.f32.vlgmr.msra.gmra.mxu2 %v1058_v7  ;;  %1180 = vmatmul.f32.gmra.mxu3 %v3282_v47  ;;  %v3356_v23 = vand.u32 4294901760, %v586_v28  ;;  %v1560_v61 = vand.u32 4294901760, %v1559_v50  ;;  %v4020_v43 = vand.u32 4294901760, %v3365_v25  ;;  %v3405_v50 = vsub.f32 %v1441_v52, %v3376_v42 }
  0xdf   :  { %1700 = vmatpush.msra.mxu3 %v3162_v49  ;;  %1232 = vmatpush.msrb.mxu0 %v3069_v2  ;;  %v1065_v2 = vsub.f32 %v3309_v15, %v1064_v18  ;;  %v1572_v59 = vand.u32 4294901760, %v1571_v34 }
  0xe0   :  { %1362 = vmatpush.msrb.mxu2 %v4059_v8  ;;  %1549 = vmatpush.msra.mxu1 %v1548_v19  ;;  %v3385_v7 = vsub.f32 %v586_v28, %v3356_v23  ;;  %v3391_v19 = vand.u32 4294901760, %v1440_v56  ;;  %v1577_v28 = vsub.f32 %v3343_v6, %v4019_v22  ;;  %v1437_v22 = vld [vmem:[%s4005_s4] sm:$0xff] }
  0xe1   :  { %1702 = vmatpush.msra.mxu3 %v3182_v4  ;;  %1235 = vmatpush.msrb.mxu0 %v3077_v48  ;;  %v1439_v48 = vld [vmem:[%s4005_s4 + $0x10] sm:$0xff]  ;;  %v1066_v46 = vand.u32 4294901760, %v1065_v2  ;;  %v3444_v12 = vand.u32 4294901760, %v1437_v22 }
  0xe2   :  { %1366 = vmatpush.msrb.mxu2 %v4060_v35  ;;  %1555 = vmatpush.msra.mxu1 %v1554_v0  ;;  %v1438_v0 = vld [vmem:[%s4005_s4 + $0x8] sm:$0xff]  ;;  %v3412_v8 = vand.u32 4294901760, %v1439_v48  ;;  %v1072_v2 = vand.u32 4294901760, %v3385_v7  ;;  %v3418_v52 = vsub.f32 %v1440_v56, %v3391_v19  ;;  %v1583_v35 = vsub.f32 %v3365_v25, %v4020_v43 }
  0xe3   :  { %1470 = vmatpush.msra.mxu0 %v3162_v49  ;;  %1704 = vmatpush.msra.mxu3 %v3192_v40  ;;  %v1578_v34 = vand.u32 4294901760, %v1577_v28  ;;  %v4026_v56 = vand.u32 4294901760, %v3405_v50 }
  0xe4   :  { %1637 = vmatpush.msra.mxu2 %v3180_v29  ;;  %969 = vmatmul.f32.gmra.mxu0 %v3127_v55  ;;  %v4023_v55 = vand.u32 4294901760, %v3382_v60  ;;  %v3437_v43 = vsub.f32 %v1439_v48, %v3412_v8  ;;  %v4025_v28 = vand.u32 4294901760, %v3418_v52  ;;  %v1584_v44 = vand.u32 4294901760, %v1583_v35 }
  0xe5   :  { %1018 = vmatmul.f32.gmra.mxu1 %v3155_v57  ;;  %1472 = vmatpush.msra.mxu0 %v3182_v4  ;;  %v1595_v48 = vsub.f32 %v3405_v50, %v4026_v56 }
  0xe6   :  { %1561 = vmatpush.msra.mxu1 %v1560_v61  ;;  %1640 = vmatpush.msra.mxu2 %v3201_v33  ;;  %v3424_v61 = vand.u32 4294901760, %v1438_v0  ;;  %v4027_v27 = vand.u32 4294901760, %v3437_v43  ;;  %v1601_v35 = vsub.f32 %v3418_v52, %v4025_v28 }
  0xe7   :  { %1706 = vmatpush.msra.mxu3 %v3203_v39  ;;  %1474 = vmatpush.msra.mxu0 %v3192_v40 }
  0xe8   :  { %1567 = vmatpush.msra.mxu1 %v1566_v37  ;;  %1643 = vmatpush.msra.mxu2 %v3216_v45  ;;  %v1589_v37 = vsub.f32 %v3382_v60, %v4023_v55  ;;  %v3449_v55 = vsub.f32 %v1438_v0, %v3424_v61  ;;  %v1602_v28 = vand.u32 4294901760, %v1601_v35 }
  0xe9   :  { %1708 = vmatpush.msra.mxu3 %v3231_v14  ;;  %1067 = vmatmul.f32.gmra.mxu2 %v1066_v46  ;;  %v1073_v46 = vsub.f32 %v3385_v7, %v1072_v2 }
  0xea   :  { %1184 = vmatmul.f32.gmra.mxu3 %v3356_v23  ;;  %1476 = vmatpush.msra.mxu0 %v3203_v39 }
  0xeb   :  { %1573 = vmatpush.msra.mxu1 %v1572_v59  ;;  %1646 = vmatpush.msra.mxu2 %v3229_v58  ;;  %v1590_v59 = vand.u32 4294901760, %v1589_v37  ;;  %v1074_v0 = vand.u32 4294901760, %v1073_v46  ;;  %v4028_v37 = vand.u32 4294901760, %v3449_v55 }
  0xec   :  { %1710 = vmatpush.msra.mxu3 %v3254_v26  ;;  %1478 = vmatpush.msra.mxu0 %v3231_v14 }
  0xed   :  { %1579 = vmatpush.msra.mxu1 %v1578_v34  ;;  %1649 = vmatpush.msra.mxu2 %v3264_v20  ;;  %v3465_v34 = vsub.f32 %v1437_v22, %v3444_v12  ;;  %v1607_v22 = vsub.f32 %v3437_v43, %v4027_v27 }
  0xee   :  { %1712 = vmatpush.msra.mxu3 %v3270_v38  ;;  %973 = vmatmul.f32.gmra.mxu0 %v3155_v57  ;;  %v1468_v57 = vld [vmem:[%s4005_s4 + $0xf8] sm:$0xff] }
  0xef   :  { %1287 = vmatmul.f32.vlgmr.msrb.gmra.mxu1 %v1056_v31  ;;  %1480 = vmatpush.msra.mxu0 %v3254_v26  ;;  %v1596_v31 = vand.u32 4294901760, %v1595_v48  ;;  %v3478_v46 = vand.u32 4294901760, %v1468_v57  ;;  %v4030_v56 = vand.u32 4294901760, %v3465_v34  ;;  %v1613_v48 = vsub.f32 %v3449_v55, %v4028_v37 }
  0xf0   :  { %1585 = vmatpush.msra.mxu1 %v1584_v44  ;;  %1652 = vmatpush.msra.mxu2 %v3289_v3  ;;  %v1467_v44 = vld [vmem:[%s4005_s4 + $0xf0] sm:$0xff]  ;;  %v1608_v35 = vand.u32 4294901760, %v1607_v22  ;;  %v1465_v22 = vld [vmem:[%s4005_s4 + $0xe0] sm:$0xff] }
  0xf1   :  { %1714 = vmatpush.msra.mxu3 %v3301_v53  ;;  %1482 = vmatpush.msra.mxu0 %v3270_v38  ;;  %v3499_v27 = vsub.f32 %v1468_v57, %v3478_v46  ;;  %v1614_v37 = vand.u32 4294901760, %v1613_v48  ;;  %v1464_v57 = vld [vmem:[%s4005_s4 + $0xd8] sm:$0xff] }
  0xf2   :  { %1591 = vmatpush.msra.mxu1 %v1590_v59  ;;  %1655 = vmatpush.msra.mxu2 %v3306_v1  ;;  %v3491_v59 = vand.u32 4294901760, %v1467_v44 }
  0xf3   :  { %1716 = vmatpush.msra.mxu3 %v3313_v36  ;;  %1075 = vmatmul.f32.gmra.mxu2 %v1074_v0  ;;  %v1466_v0 = vld [vmem:[%s4005_s4 + $0xe8] sm:$0xff] }
  0xf4   :  { %1413 = vmatmul.f32.vlgmr.msrb.gmra.mxu3 %v3218_v30  ;;  %1484 = vmatpush.msra.mxu0 %v3301_v53  ;;  %v3507_v32 = vand.u32 4294901760, %v1466_v0 }
  0xf5   :  { %1597 = vmatpush.msra.mxu1 %v1596_v31  ;;  %1658 = vmatpush.msra.mxu2 %v3327_v41  ;;  %v1619_v31 = vsub.f32 %v3465_v34, %v4030_v56  ;;  %v3534_v56 = vand.u32 4294901760, %v1464_v57 }
  0xf6   :  { %1718 = vmatpush.msra.mxu3 %v3338_v13  ;;  %1486 = vmatpush.msra.mxu0 %v3313_v36 }
  0xf7   :  { %1603 = vmatpush.msra.mxu1 %v1602_v28  ;;  %1661 = vmatpush.msra.mxu2 %v3343_v6  ;;  %v3516_v28 = vsub.f32 %v1467_v44, %v3491_v59  ;;  %v1620_v48 = vand.u32 4294901760, %v1619_v31  ;;  %v3529_v44 = vsub.f32 %v1466_v0, %v3507_v32  ;;  %v1463_v31 = vld [vmem:[%s4005_s4 + $0xd0] sm:$0xff]  ;;  %v1462_v0 = vld [vmem:[%s4005_s4 + $0xc8] sm:$0xff] }
  0xf8   :  { %1720 = vmatpush.msra.mxu3 %v3349_v51  ;;  %1238 = vmatmul.f32.vlgmr.msrb.gmra.mxu0 %v3237_v9  ;;  %v4033_v9 = vand.u32 4294901760, %v3499_v27 }
  0xf9   :  { %1293 = vmatmul.f32.gmra.mxu1 %v1064_v18  ;;  %1488 = vmatpush.msra.mxu0 %v3338_v13  ;;  %v3525_v18 = vand.u32 4294901760, %v1465_v22  ;;  %4061 = vst [vmem:[#allocation6_spill] sm:$0xff] %v3529_v44  ;;  %v4037_v54 = vand.u32 4294901760, %v3529_v44 }
  0xfa   :  { %1609 = vmatpush.msra.mxu1 %v1608_v35  ;;  %1664 = vmatpush.msra.mxu2 %v3365_v25  ;;  %v4035_v35 = vand.u32 4294901760, %v3516_v28 }
  0xfb   :  { %1722 = vmatpush.msra.mxu3 %v3376_v42  ;;  %1490 = vmatpush.msra.mxu0 %v3349_v51 }
  0xfc   :  { %1615 = vmatpush.msra.mxu1 %v1614_v37  ;;  %1667 = vmatpush.msra.mxu2 %v3382_v60  ;;  %v1932_v37 = vsub.f32 %v3499_v27, %v4033_v9  ;;  %v3556_v9 = vand.u32 4294901760, %v1463_v31 }
  0xfd   :  { %1724 = vmatpush.msra.mxu3 %v3391_v19  ;;  %1368 = vmatmul.f32.vlgmr.msrb.gmra.mxu2 %v3218_v30  ;;  %v3546_v30 = vsub.f32 %v1465_v22, %v3525_v18  ;;  %v1938_v22 = vsub.f32 %v3516_v28, %v4035_v35  ;;  %v3593_v35 = vand.u32 4294901760, %v1461_v21 }
  0xfe   :  { %1417 = vmatmul.f32.gmra.mxu3 %v3282_v47  ;;  %1492 = vmatpush.msra.mxu0 %v3376_v42  ;;  %v1933_v16 = vand.u32 4294901760, %v1932_v37  ;;  %v3585_v37 = vsub.f32 %v1463_v31, %v3556_v9 }
  0xff   :  { %1621 = vmatpush.msra.mxu1 %v1620_v48  ;;  %1670 = vmatpush.msra.mxu2 %v3405_v50  ;;  %4062 = vst [vmem:[#allocation7_spill] sm:$0xff] %v3546_v30  ;;  %v3564_v48 = vsub.f32 %v1464_v57, %v3534_v56  ;;  %v3577_v57 = vand.u32 4294901760, %v1431_v63  ;;  %v1939_v24 = vand.u32 4294901760, %v1938_v22  ;;  %v4064_v31 = vand.u32 4294901760, %v3546_v30  ;;  %v1459_v22 = vld [vmem:[%s4005_s4 + $0xb0] sm:$0xff] }
 0x100   :  { %1726 = vmatpush.msra.mxu3 %v3412_v8  ;;  %1494 = vmatpush.msra.mxu0 %v3391_v19  ;;  %4063 = vst [vmem:[#allocation8_spill] sm:$0xff] %v3585_v37 }
 0x101   :  { %1828 = vmatpush.msrb.mxu1 %v3162_v49  ;;  %1673 = vmatpush.msra.mxu2 %v3418_v52  ;;  %v3568_v49 = vand.u32 4294901760, %v1462_v0  ;;  %v1950_v17 = vsub.f32 %v3546_v30, %v4064_v31  ;;  %v3620_v30 = vsub.f32 %v1461_v21, %v3593_v35 }
 0x102   :  { %1728 = vmatpush.msra.mxu3 %v3424_v61  ;;  %1243 = vmatmul.f32.gmra.mxu0 %v3309_v15  ;;  %v1944_v15 = vsub.f32 %v3529_v44, %v4037_v54 }
 0x103   :  { %1299 = vmatmul.f32.gmra.mxu1 %v1072_v2  ;;  %1496 = vmatpush.msra.mxu0 %v3412_v8  ;;  %v1460_v2 = vld [vmem:[%s4005_s4 + $0xb8] sm:$0xff]  ;;  %v3597_v54 = vsub.f32 %v1462_v0, %v3568_v49  ;;  %4065 = vst [vmem:[#allocation9_spill] sm:$0xff] %v3620_v30  ;;  %v1951_v21 = vand.u32 4294901760, %v1950_v17  ;;  %v4067_v17 = vand.u32 4294901760, %v3201_v33 }
 0x104   :  { %1830 = vmatpush.msrb.mxu1 %v3182_v4  ;;  %1676 = vmatpush.msra.mxu2 %v3437_v43  ;;  %v4042_v4 = vand.u32 4294901760, %v3564_v48  ;;  %v3604_v44 = vand.u32 4294901760, %v1460_v2  ;;  %v1945_v0 = vand.u32 4294901760, %v1944_v15  ;;  %v3631_v15 = vand.u32 4294901760, %v1459_v22  ;;  %v1456_v33 = vld [vmem:[%s4005_s4 + $0x98] sm:$0xff] }
 0x105   :  { %1730 = vmatpush.msra.mxu3 %v3444_v12  ;;  %1498 = vmatpush.msra.mxu0 %v3424_v61 }
 0x106   :  { %1832 = vmatpush.msrb.mxu1 %v3192_v40  ;;  %1679 = vmatpush.msra.mxu2 %v3449_v55  ;;  %v3610_v40 = vsub.f32 %v1431_v63, %v3577_v57  ;;  %v1956_v31 = vsub.f32 %v3564_v48, %v4042_v4  ;;  %v1458_v63 = vld [vmem:[%s4005_s4 + $0xa8] sm:$0xff]  ;;  %v3636_v4 = vsub.f32 %v1460_v2, %v3604_v44 }
 0x107   :  { %1934 = vmatpush.msrb.mxu3 %v1933_v16  ;;  %1372 = vmatmul.f32.gmra.mxu2 %v3282_v47  ;;  %v4043_v16 = vand.u32 4294901760, %v3585_v37  ;;  %v4046_v47 = vand.u32 4294901760, %v3597_v54 }
 0x108   :  { %1421 = vmatmul.f32.gmra.mxu3 %v3356_v23  ;;  %1834 = vmatpush.msrb.mxu1 %v3203_v39  ;;  %v1433_v39 = vmul.f32 %v3118_v5, %v3118_v5  ;;  %v1503_v5 = vand.u32 4294901760, %v3610_v40  ;;  %v1957_v2 = vand.u32 4294901760, %v1956_v31  ;;  %v4068_v31 = vand.u32 4294901760, %v3216_v45 }
 0x109   :  { %1940 = vmatpush.msrb.mxu3 %v1939_v24  ;;  %1500 = vmatpush.msra.mxu0 %v3444_v12  ;;  %v4066_v24 = vand.u32 4294901760, %v3180_v29  ;;  %v1962_v29 = vsub.f32 %v3585_v37, %v4043_v16  ;;  %v1968_v16 = vsub.f32 %v3597_v54, %v4046_v47  ;;  %v3660_v37 = vsub.f32 %v1459_v22, %v3631_v15 }
 0x10a   :  { %1682 = vmatpush.msra.mxu2 %v3465_v34  ;;  %1836 = vmatpush.msrb.mxu1 %v3231_v14  ;;  %v1457_v14 = vld [vmem:[%s4005_s4 + $0xa0] sm:$0xff]  ;;  %v1504_v22 = vsub.f32 %v3610_v40, %v1503_v5  ;;  %v4069_v45 = vand.u32 4294901760, %v3620_v30 }
 0x10b   :  { %1753 = vmatpush.msrb.mxu0 %v4066_v24  ;;  %1946 = vmatpush.msrb.mxu3 %v1945_v0  ;;  %v3643_v24 = vand.u32 4294901760, %v1458_v63  ;;  %v3652_v0 = vand.u32 4294901760, %v1433_v39  ;;  %v1963_v47 = vand.u32 4294901760, %v1962_v29 }
 0x10c   :  { %1873 = vmatpush.msrb.mxu2 %v3478_v46  ;;  %1248 = vmatmul.f32.gmra.mxu0 %v3385_v7 }
 0x10d   :  { %1623 = vmatmul.f32.vlgmr.msra.gmra.mxu1 %v3577_v57  ;;  %1757 = vmatpush.msrb.mxu0 %v4067_v17  ;;  %v4049_v17 = vand.u32 4294901760, %v3636_v4  ;;  %v3674_v7 = vsub.f32 %v1458_v63, %v3643_v24  ;;  %v3686_v29 = vsub.f32 %v1433_v39, %v3652_v0  ;;  %v4070_v63 = vand.u32 4294901760, %v3229_v58  ;;  %v1454_v39 = vld [vmem:[%s4005_s4 + $0x88] sm:$0xff] }
 0x10e   :  { %1838 = vmatpush.msrb.mxu1 %v3254_v26  ;;  %1875 = vmatpush.msrb.mxu2 %v3491_v59  ;;  %v3668_v26 = vand.u32 4294901760, %v1457_v14  ;;  %v4071_v58 = vand.u32 4294901760, %v3264_v20 }
 0x10f   :  { %1952 = vmatpush.msrb.mxu3 %v1951_v21  ;;  %1761 = vmatpush.msrb.mxu0 %v4068_v31  ;;  %v1974_v21 = vsub.f32 %v3620_v30, %v4069_v45  ;;  %v3680_v31 = vand.u32 4294901760, %v1456_v33  ;;  %v1980_v45 = vsub.f32 %v3636_v4, %v4049_v17  ;;  %v1511_v20 = vand.u32 4294901760, %v3686_v29 }
 0x110   :  { %1840 = vmatpush.msrb.mxu1 %v3270_v38  ;;  %1877 = vmatpush.msrb.mxu2 %v3507_v32  ;;  %v1455_v38 = vld [vmem:[%s4005_s4 + $0x90] sm:$0xff]  ;;  %v3697_v30 = vsub.f32 %v1457_v14, %v3668_v26 }
 0x111   :  { %1958 = vmatpush.msrb.mxu3 %v1957_v2  ;;  %1376 = vmatmul.f32.gmra.mxu2 %v3356_v23  ;;  %v1969_v2 = vand.u32 4294901760, %v1968_v16  ;;  %v1985_v23 = vand.u32 4294901760, %v3660_v37  ;;  %v1505_v16 = vand.u32 4294901760, %v1504_v22  ;;  %v1975_v14 = vand.u32 4294901760, %v1974_v21 }
 0x112   :  { %1734 = vmatmul.f32.vlgmr.msra.gmra.mxu3 %v1503_v5  ;;  %1765 = vmatpush.msrb.mxu0 %v4070_v63  ;;  %v3705_v5 = vand.u32 4294901760, %v1455_v38  ;;  %v1435_v63 = vmul.f32 %v3145_v11, %v3145_v11  ;;  %v3712_v17 = vsub.f32 %v1456_v33, %v3680_v31  ;;  %v3718_v22 = vand.u32 4294901760, %v1454_v39  ;;  %v1453_v11 = vld [vmem:[%s4005_s4 + $0x80] sm:$0xff]  ;;  %s42_s4 = sld [smem:[#allocation2]] }
 0x113   :  { %1842 = vmatpush.msrb.mxu1 %v3301_v53  ;;  %1879 = vmatpush.msrb.mxu2 %v3525_v18  ;;  %v4050_v53 = vand.u32 4294901760, %v3674_v7  ;;  %v1981_v33 = vand.u32 4294901760, %v1980_v45  ;;  %v1997_v21 = vand.u32 4294901760, %v3697_v30 }
 0x114   :  { %1964 = vmatpush.msrb.mxu3 %v1963_v47  ;;  %1769 = vmatpush.msrb.mxu0 %v4071_v58  ;;  %v1986_v47 = vsub.f32 %v3660_v37, %v1985_v23  ;;  %v3733_v58 = vsub.f32 %v1455_v38, %v3705_v5  ;;  %v2003_v45 = vand.u32 4294901760, %v3712_v17  ;;  %v3746_v38 = vsub.f32 %v1454_v39, %v3718_v22 }
 0x115   :  { %1844 = vmatpush.msrb.mxu1 %v3313_v36  ;;  %1881 = vmatpush.msrb.mxu2 %v3534_v56  ;;  %v4072_v36 = vand.u32 4294901760, %v3289_v3  ;;  %v4073_v3 = vand.u32 4294901760, %v3306_v1  ;;  %v1998_v1 = vsub.f32 %v3697_v30, %v1997_v21 }
 0x116   :  { %1970 = vmatpush.msrb.mxu3 %v1969_v2  ;;  %1506 = vmatmul.f32.vlgmr.msra.gmra.mxu0 %v1505_v16  ;;  %v1992_v2 = vsub.f32 %v3674_v7, %v4050_v53  ;;  %v3735_v16 = vand.u32 4294901760, %v1435_v63  ;;  %v1512_v53 = vsub.f32 %v3686_v29, %v1511_v20 }
 0x117   :  { %1627 = vmatmul.f32.gmra.mxu1 %v3652_v0  ;;  %1773 = vmatpush.msrb.mxu0 %v4072_v36  ;;  %v3740_v36 = vand.u32 4294901760, %v1453_v11 }
 0x118   :  { %1846 = vmatpush.msrb.mxu1 %v3338_v13  ;;  %1883 = vmatpush.msrb.mxu2 %v3556_v9  ;;  %v1987_v13 = vand.u32 4294901760, %v1986_v47  ;;  %v1518_v47 = vsub.f32 %v1435_v63, %v3735_v16 }
 0x119   :  { %1976 = vmatpush.msrb.mxu3 %v1975_v14  ;;  %1777 = vmatpush.msrb.mxu0 %v4073_v3  ;;  %v4074_v14 = vand.u32 4294901760, %v3327_v41  ;;  %v2009_v3 = vand.u32 4294901760, %v3733_v58  ;;  %v3762_v39 = vsub.f32 %v1453_v11, %v3740_v36  ;;  %v4075_v41 = vand.u32 4294901760, %v3343_v6 }
 0x11a   :  { %1848 = vmatpush.msrb.mxu1 %v3349_v51  ;;  %1885 = vmatpush.msrb.mxu2 %v3568_v49  ;;  %v1993_v51 = vand.u32 4294901760, %v1992_v2  ;;  %v4076_v11 = vand.u32 4294901760, %v3365_v25 }
 0x11b   :  { %1982 = vmatpush.msrb.mxu3 %v1981_v33  ;;  %1685 = vmatmul.f32.vlgmr.msra.gmra.mxu2 %v3610_v40  ;;  %v2004_v40 = vsub.f32 %v3712_v17, %v2003_v45  ;;  %v2015_v33 = vand.u32 4294901760, %v3746_v38  ;;  %v2010_v63 = vsub.f32 %v3733_v58, %v2009_v3  ;;  %v2021_v2 = vand.u32 4294901760, %v3762_v39 }
 0x11c   :  { %1740 = vmatmul.f32.gmra.mxu3 %v1511_v20  ;;  %1781 = vmatpush.msrb.mxu0 %v4074_v14  ;;  %v1513_v20 = vand.u32 4294901760, %v1512_v53  ;;  %v1519_v53 = vand.u32 4294901760, %v1518_v47 }
 0x11d   :  { %1850 = vmatpush.msrb.mxu1 %v3376_v42  ;;  %1887 = vmatpush.msrb.mxu2 %v3593_v35  ;;  %v1999_v42 = vand.u32 4294901760, %v1998_v1  ;;  %v2005_v6 = vand.u32 4294901760, %v2004_v40  ;;  %v2011_v25 = vand.u32 4294901760, %v2010_v63  ;;  %v1432_v1 = vmul.f32 %v3208_v62, %v3208_v62 }
 0x11e   :  { %1988 = vmatpush.msrb.mxu3 %v1987_v13  ;;  %1785 = vmatpush.msrb.mxu0 %v4075_v41  ;;  %v4077_v13 = vand.u32 4294901760, %v3382_v60  ;;  %v2022_v14 = vsub.f32 %v3762_v39, %v2021_v2  ;;  %v4078_v60 = vand.u32 4294901760, %v3405_v50  ;;  %v1434_v41 = vmul.f32 %v3268_v10, %v3268_v10 }
 0x11f   :  { %1852 = vmatpush.msrb.mxu1 %v3391_v19  ;;  %1889 = vmatpush.msrb.mxu2 %v3604_v44  ;;  %v2016_v19 = vsub.f32 %v3746_v38, %v2015_v33  ;;  %v3796_v62 = vand.u32 4294901760, %v1432_v1  ;;  %v4083_v10 = vand.u32 4294901760, %v3499_v27 }
 0x120   :  { %1994 = vmatpush.msrb.mxu3 %v1993_v51  ;;  %1514 = vmatmul.f32.gmra.mxu0 %v1513_v20  ;;  %v2023_v40 = vand.u32 4294901760, %v2022_v14  ;;  %v4082_v20 = vand.u32 4294901760, %v3465_v34  ;;  %v4084_v34 = vand.u32 4294901760, %v3516_v28 }
 0x121   :  { %1631 = vmatmul.f32.gmra.mxu1 %v3735_v16  ;;  %1789 = vmatpush.msrb.mxu0 %v4076_v11  ;;  %v2017_v51 = vand.u32 4294901760, %v2016_v19  ;;  %v3807_v50 = vsub.f32 %v1432_v1, %v3796_v62  ;;  %v4090_v1 = vand.u32 4294901760, %v3564_v48 }
 0x122   :  { %1854 = vmatpush.msrb.mxu1 %v3412_v8  ;;  %1891 = vmatpush.msrb.mxu2 %v3631_v15  ;;  %v1520_v8 = vsub.f32 %v1518_v47, %v1519_v53 }
 0x123   :  { %2000 = vmatpush.msrb.mxu3 %v1999_v42  ;;  %1793 = vmatpush.msrb.mxu0 %v4077_v13 }
 0x124   :  { %1856 = vmatpush.msrb.mxu1 %v3424_v61  ;;  %1893 = vmatpush.msrb.mxu2 %v3643_v24  ;;  %v4079_v61 = vand.u32 4294901760, %v3418_v52  ;;  %v4081_v52 = vand.u32 4294901760, %v3449_v55  ;;  %v3824_v55 = vand.u32 4294901760, %v1434_v41 }
 0x125   :  { %2006 = vmatpush.msrb.mxu3 %v2005_v6  ;;  %1690 = vmatmul.f32.gmra.mxu2 %v3686_v29  ;;  %v1521_v29 = vand.u32 4294901760, %v1520_v8  ;;  %v4091_v8 = vld [vmem:[#allocation8_spill] sm:$0xff] }
 0x126   :  { %1746 = vmatmul.f32.gmra.mxu3 %v1519_v53  ;;  %1797 = vmatpush.msrb.mxu0 %v4078_v60  ;;  %v4092_v14 = vand.u32 4294901760, %v4091_v8 }
 0x127   :  { %1858 = vmatpush.msrb.mxu1 %v3444_v12  ;;  %1895 = vmatpush.msrb.mxu2 %v3668_v26  ;;  %v4080_v12 = vand.u32 4294901760, %v3437_v43  ;;  %v1906_v43 = vand.u32 4294901760, %v3807_v50 }
 0x128   :  { %2012 = vmatpush.msrb.mxu3 %v2011_v25  ;;  %1801 = vmatpush.msrb.mxu0 %v4079_v61 }
 0x129   :  { %2103 = vmatpush.msra.mxu1 %v3478_v46  ;;  %1897 = vmatpush.msrb.mxu2 %v3680_v31 }
 0x12a   :  { %2018 = vmatpush.msrb.mxu3 %v2017_v51  ;;  %1522 = vmatmul.f32.gmra.mxu0 %v1521_v29  ;;  %v4094_v29 = vld [vmem:[#allocation9_spill] sm:$0xff] }
 0x12b   :  { %2105 = vmatpush.msra.mxu1 %v3491_v59  ;;  %1805 = vmatpush.msrb.mxu0 %v4080_v12 }
 0x12c   :  { %1860 = vmatmul.f32.vlgmr.msrb.gmra.mxu1 %v3577_v57  ;;  %1899 = vmatpush.msrb.mxu2 %v3705_v5 }
 0x12d   :  { %2024 = vmatpush.msrb.mxu3 %v2023_v40  ;;  %2107 = vmatpush.msra.mxu1 %v3507_v32  ;;  %v4095_v40 = vand.u32 4294901760, %v4094_v29 }
 0x12e   :  { %1809 = vmatpush.msrb.mxu0 %v4081_v52  ;;  %1901 = vmatpush.msrb.mxu2 %v3718_v22 }
 0x12f   :  { %2231 = vmatpush.msra.mxu3 %v3478_v46  ;;  %2109 = vmatpush.msra.mxu1 %v3525_v18  ;;  %v1907_v46 = vsub.f32 %v3807_v50, %v1906_v43 }
 0x130   :  { %1695 = vmatmul.f32.gmra.mxu2 %v1518_v47  ;;  %1813 = vmatpush.msrb.mxu0 %v4082_v20  ;;  %v4087_v47 = vld [vmem:[#allocation5_spill] sm:$0xff] }
 0x131   :  { %2233 = vmatpush.msra.mxu3 %v3491_v59  ;;  %1903 = vmatpush.msrb.mxu2 %v3740_v36  ;;  %v1436_v42 = vmul.f32 %v4087_v47, %v4087_v47 }
 0x132   :  { %2026 = vmatmul.f32.vlgmr.msrb.gmra.mxu3 %v3796_v62  ;;  %2040 = vmatpush.msra.mxu0 %v3499_v27  ;;  %v3840_v27 = vsub.f32 %v1434_v41, %v3824_v55  ;;  %v4096_v41 = vand.u32 4294901760, %v3636_v4 }
 0x133   :  { %2111 = vmatpush.msra.mxu1 %v3534_v56  ;;  %2156 = vmatpush.msra.mxu2 %v4083_v10  ;;  %v3858_v25 = vand.u32 4294901760, %v1436_v42 }
 0x134   :  { %2235 = vmatpush.msra.mxu3 %v3507_v32  ;;  %2043 = vmatpush.msra.mxu0 %v3516_v28  ;;  %v4085_v32 = vld [vmem:[#allocation6_spill] sm:$0xff]  ;;  %v774_v28 = vpop.f32.mrf.mxu1  ;;  %v1914_v19 = vand.u32 4294901760, %v3840_v27 }
 0x135   :  { %2113 = vmatpush.msra.mxu1 %v3556_v9  ;;  %2160 = vmatpush.msra.mxu2 %v4084_v34  ;;  %v4086_v59 = vand.u32 4294901760, %v4085_v32 }
 0x136   :  { %2237 = vmatpush.msra.mxu3 %v3525_v18  ;;  %1815 = vmatmul.f32.vlgmr.msrb.gmra.mxu0 %v3577_v57  ;;  %v4088_v18 = vld [vmem:[#allocation7_spill] sm:$0xff]  ;;  %v1908_v57 = vand.u32 4294901760, %v1907_v46  ;;  %v1915_v60 = vsub.f32 %v3840_v27, %v1914_v19 }
 0x137   :  { %1864 = vmatmul.f32.gmra.mxu1 %v3652_v0  ;;  %2046 = vmatpush.msra.mxu0 %v4085_v32  ;;  %v4089_v11 = vand.u32 4294901760, %v4088_v18 }
 0x138   :  { %2115 = vmatpush.msra.mxu1 %v3568_v49  ;;  %2164 = vmatpush.msra.mxu2 %v4086_v59 }
 0x139   :  { %2239 = vmatpush.msra.mxu3 %v3534_v56  ;;  %2049 = vmatpush.msra.mxu0 %v4088_v18  ;;  %v657_v63 = vpop.f32.mrf.mxu0  ;;  %v836_v53 = vpop.f32.mrf.mxu2 }
 0x13a   :  { %2117 = vmatpush.msra.mxu1 %v3593_v35  ;;  %2168 = vmatpush.msra.mxu2 %v4089_v11  ;;  %v775_v6 = vadd.f32 %v774_v28, %v657_v63 }
 0x13b   :  { %2241 = vmatpush.msra.mxu3 %v3556_v9  ;;  %1909 = vmatmul.f32.vlgmr.msrb.gmra.mxu2 %v1908_v57  ;;  %v885_v13 = vpop.f32.mrf.mxu3 }
 0x13c   :  { %2030 = vmatmul.f32.gmra.mxu3 %v3824_v55  ;;  %2052 = vmatpush.msra.mxu0 %v3564_v48  ;;  %v837_v56 = vadd.f32 %v836_v53, %v775_v6  ;;  %v3876_v48 = vsub.f32 %v1436_v42, %v3858_v25  ;;  %v778_v51 = vpop.f32.mrf.mxu1 }
 0x13d   :  { %2119 = vmatpush.msra.mxu1 %v3604_v44  ;;  %2172 = vmatpush.msra.mxu2 %v4090_v1 }
 0x13e   :  { %2243 = vmatpush.msra.mxu3 %v3568_v49  ;;  %2055 = vmatpush.msra.mxu0 %v4091_v8  ;;  %v3865_v9 = vadd.f32 %v885_v13, %v837_v56  ;;  %v4093_v49 = vand.u32 4294901760, %v3597_v54 }
 0x13f   :  { %2121 = vmatpush.msra.mxu1 %v3631_v15  ;;  %2176 = vmatpush.msra.mxu2 %v4092_v14 }
 0x140   :  { %2245 = vmatpush.msra.mxu3 %v3593_v35  ;;  %1819 = vmatmul.f32.gmra.mxu0 %v3652_v0  ;;  %v1916_v35 = vand.u32 4294901760, %v1915_v60 }
 0x141   :  { %1868 = vmatmul.f32.gmra.mxu1 %v3735_v16  ;;  %2058 = vmatpush.msra.mxu0 %v3597_v54  ;;  %v841_v12 = vpop.f32.mrf.mxu2  ;;  %v1922_v54 = vand.u32 4294901760, %v3876_v48 }
 0x142   :  { %2123 = vmatpush.msra.mxu1 %v3643_v24  ;;  %2180 = vmatpush.msra.mxu2 %v4093_v49  ;;  %v665_v61 = vpop.f32.mrf.mxu0 }
 0x143   :  { %2247 = vmatpush.msra.mxu3 %v3604_v44  ;;  %2061 = vmatpush.msra.mxu0 %v4094_v29  ;;  %v779_v0 = vadd.f32 %v778_v51, %v665_v61 }
 0x144   :  { %2125 = vmatpush.msra.mxu1 %v3668_v26  ;;  %2184 = vmatpush.msra.mxu2 %v4095_v40  ;;  %v891_v44 = vpop.f32.mrf.mxu3 }
 0x145   :  { %2249 = vmatpush.msra.mxu3 %v3631_v15  ;;  %1917 = vmatmul.f32.gmra.mxu2 %v1916_v35  ;;  %v842_v52 = vadd.f32 %v841_v12, %v779_v0  ;;  %v1923_v15 = vsub.f32 %v3876_v48, %v1922_v54 }
 0x146   :  { %2034 = vmatmul.f32.gmra.mxu3 %v3858_v25  ;;  %2064 = vmatpush.msra.mxu0 %v3636_v4  ;;  %v4097_v4 = vand.u32 4294901760, %v3674_v7 }
 0x147   :  { %2127 = vmatpush.msra.mxu1 %v3680_v31  ;;  %2188 = vmatpush.msra.mxu2 %v4096_v41  ;;  %v892_v20 = vadd.f32 %v891_v44, %v842_v52 }
 0x148   :  { %2251 = vmatpush.msra.mxu3 %v3643_v24  ;;  %2067 = vmatpush.msra.mxu0 %v3660_v37  ;;  %v782_v24 = vpop.f32.mrf.mxu1  ;;  %v1924_v37 = vand.u32 4294901760, %v1923_v15 }
 0x149   :  { %2129 = vmatpush.msra.mxu1 %v3705_v5  ;;  %2192 = vmatpush.msra.mxu2 %v1985_v23 }
 0x14a   :  { %2253 = vmatpush.msra.mxu3 %v3668_v26  ;;  %1823 = vmatmul.f32.gmra.mxu0 %v3735_v16 }
 0x14b   :  { %2070 = vmatpush.msra.mxu0 %v3674_v7  ;;  %2131 = vmatpush.msra.mxu1 %v3718_v22  ;;  %v846_v26 = vpop.f32.mrf.mxu2 }
 0x14c   :  { %2196 = vmatpush.msra.mxu2 %v4097_v4  ;;  %2255 = vmatpush.msra.mxu3 %v3680_v31  ;;  %v673_v10 = vpop.f32.mrf.mxu0 }
 0x14d   :  { %2073 = vmatpush.msra.mxu0 %v3697_v30  ;;  %2133 = vmatpush.msra.mxu1 %v3740_v36  ;;  %v783_v23 = vadd.f32 %v782_v24, %v673_v10 }
 0x14e   :  { %2200 = vmatpush.msra.mxu2 %v1997_v21  ;;  %2257 = vmatpush.msra.mxu3 %v3705_v5  ;;  %v897_v31 = vpop.f32.mrf.mxu3 }
 0x14f   :  { %1925 = vmatmul.f32.gmra.mxu2 %v1924_v37  ;;  %2137 = vmatmul.f32.vlgmr.msra.gmra.mxu1 %v1906_v43  ;;  %v847_v7 = vadd.f32 %v846_v26, %v783_v23 }
 0x150   :  { %2076 = vmatpush.msra.mxu0 %v3712_v17  ;;  %2204 = vmatpush.msra.mxu2 %v2003_v45  ;;  %v1011_v5 = vpop.f32.mrf.mxu1 }
 0x151   :  { %2259 = vmatpush.msra.mxu3 %v3718_v22  ;;  %v898_v16 = vadd.f32 %v897_v31, %v847_v7 }
 0x152   :  { %2079 = vmatpush.msra.mxu0 %v3733_v58  ;;  %2208 = vmatpush.msra.mxu2 %v2009_v3 }
 0x153   :  { %2261 = vmatpush.msra.mxu3 %v3740_v36 }
 0x154   :  { %2263 = vmatmul.f32.vlgmr.msra.gmra.mxu3 %v3796_v62  ;;  %2082 = vmatpush.msra.mxu0 %v3746_v38  ;;  %v966_v30 = vpop.f32.mrf.mxu0 }
 0x155   :  { %2212 = vmatpush.msra.mxu2 %v2015_v33  ;;  %v967_v17 = vadd.f32 %v966_v30, %v3865_v9 }
 0x156   :  { %2085 = vmatpush.msra.mxu0 %v3762_v39 }
 0x157   :  { %2216 = vmatpush.msra.mxu2 %v2021_v2  ;;  %2088 = vmatmul.f32.vlgmr.msra.gmra.mxu0 %v3807_v50  ;;  %v1012_v22 = vadd.f32 %v1011_v5, %v967_v17  ;;  %v1177_v3 = vpop.f32.mrf.mxu3 }
 0x158   :  { %2143 = vmatmul.f32.gmra.mxu1 %v1914_v19  ;;  %2218 = vmatmul.f32.vlgmr.msra.gmra.mxu2 %v3796_v62  ;;  %v1015_v45 = vpop.f32.mrf.mxu1 }
 0x15c   :  { %2267 = vmatmul.f32.gmra.mxu3 %v3824_v55 }
 0x15f   :  { %2093 = vmatmul.f32.gmra.mxu0 %v3840_v27 }
 0x160   :  { %2149 = vmatmul.f32.gmra.mxu1 %v1922_v54  ;;  %2222 = vmatmul.f32.gmra.mxu2 %v3824_v55 }
 0x161   :  { %v970_v21 = vpop.f32.mrf.mxu0  ;;  %v1060_v58 = vpop.f32.mrf.mxu2 }
 0x162   :  { %v971_v36 = vadd.f32 %v970_v21, %v892_v20  ;;  %v1061_v38 = vadd.f32 %v1060_v58, %v1012_v22  ;;  %v1019_v62 = vpop.f32.mrf.mxu1  ;;  %v1181_v34 = vpop.f32.mrf.mxu3 }
 0x164   :  { %2271 = vmatmul.f32.gmra.mxu3 %v3858_v25  ;;  %v1016_v39 = vadd.f32 %v1015_v45, %v971_v36  ;;  %v1178_v33 = vadd.f32 %v1177_v3, %v1061_v38 }
 0x167   :  { %2098 = vmatmul.f32.gmra.mxu0 %v3876_v48 }
 0x168   :  { %2226 = vmatmul.f32.gmra.mxu2 %v3858_v25 }
 0x16b   :  { %v974_v2 = vpop.f32.mrf.mxu0 }
 0x16c   :  { %v975_v50 = vadd.f32 %v974_v2, %v898_v16  ;;  %v1068_v43 = vpop.f32.mrf.mxu2  ;;  %v1288_v59 = vpop.f32.mrf.mxu1 }
 0x16d   :  { %v1069_v55 = vadd.f32 %v1068_v43, %v1016_v39  ;;  %v1185_v42 = vpop.f32.mrf.mxu3 }
 0x16e   :  { %v1020_v46 = vadd.f32 %v1019_v62, %v975_v50 }
 0x16f   :  { %v1182_v27 = vadd.f32 %v1181_v34, %v1069_v55 }
 0x175   :  { %v1239_v32 = vpop.f32.mrf.mxu0 }
 0x176   :  { %v1240_v28 = vadd.f32 %v1239_v32, %v1178_v33  ;;  %v1076_v47 = vpop.f32.mrf.mxu2  ;;  %v1294_v6 = vpop.f32.mrf.mxu1 }
 0x177   :  { %v1077_v18 = vadd.f32 %v1076_v47, %v1020_v46  ;;  %v1414_v56 = vpop.f32.mrf.mxu3 }
 0x178   :  { %v1289_v57 = vadd.f32 %v1288_v59, %v1240_v28 }
 0x179   :  { %v1186_v63 = vadd.f32 %v1185_v42, %v1077_v18 }
 0x17f   :  { %v1244_v11 = vpop.f32.mrf.mxu0 }
 0x180   :  { %v1245_v53 = vadd.f32 %v1244_v11, %v1182_v27  ;;  %v1369_v19 = vpop.f32.mrf.mxu2  ;;  %v1300_v9 = vpop.f32.mrf.mxu1 }
 0x181   :  { %v1370_v13 = vadd.f32 %v1369_v19, %v1289_v57  ;;  %v1418_v60 = vpop.f32.mrf.mxu3 }
 0x182   :  { %v1295_v25 = vadd.f32 %v1294_v6, %v1245_v53 }
 0x183   :  { %v3941_v1 = vadd.f32 %v1414_v56, %v1370_v13 }
 0x189   :  { %v1249_v8 = vpop.f32.mrf.mxu0 }
 0x18a   :  { %v1250_v14 = vadd.f32 %v1249_v8, %v1186_v63  ;;  %v1373_v48 = vpop.f32.mrf.mxu2  ;;  %v1624_v54 = vpop.f32.mrf.mxu1 }
 0x18b   :  { %v1374_v49 = vadd.f32 %v1373_v48, %v1295_v25  ;;  %v1422_v35 = vpop.f32.mrf.mxu3 }
 0x18c   :  { %v1301_v51 = vadd.f32 %v1300_v9, %v1250_v14 }
 0x18d   :  { %v3943_v61 = vadd.f32 %v1418_v60, %v1374_v49 }
 0x193   :  { %v1507_v12 = vpop.f32.mrf.mxu0 }
 0x194   :  { %v1377_v29 = vpop.f32.mrf.mxu2  ;;  %v1628_v20 = vpop.f32.mrf.mxu1  ;;  %v1625_v30 = vadd.f32 %v1624_v54, %v1507_v12 }
 0x195   :  { %v1378_v0 = vadd.f32 %v1377_v29, %v1301_v51  ;;  %v1735_v52 = vpop.f32.mrf.mxu3 }
 0x197   :  { %v3945_v40 = vadd.f32 %v1422_v35, %v1378_v0 }
 0x19d   :  { %v1515_v41 = vpop.f32.mrf.mxu0 }
 0x19e   :  { %v1686_v44 = vpop.f32.mrf.mxu2  ;;  %v1632_v10 = vpop.f32.mrf.mxu1  ;;  %v1629_v36 = vadd.f32 %v1628_v20, %v1515_v41  ;;  %v46_v41 = vld [vmem:[%s4006_s5] sm:$0xff]  ;;  %v49_v20 = vstv %s42_s4 }
 0x19f   :  { %v1741_v15 = vpop.f32.mrf.mxu3  ;;  %v1687_v22 = vadd.f32 %v1686_v44, %v1625_v30  ;;  %vm2333_vm3 = vcmp.eq.f32.partialorder %v46_v41, 0.0 }
 0x1a1   :  { %v1736_v58 = vadd.f32 %v1735_v52, %v1687_v22 }
 0x1a7   :  { %v1523_v24 = vpop.f32.mrf.mxu0 }
 0x1a8   :  { %v1691_v4 = vpop.f32.mrf.mxu2  ;;  %v1633_v34 = vadd.f32 %v1632_v10, %v1523_v24 }
 0x1a9   :  { %v1747_v37 = vpop.f32.mrf.mxu3  ;;  %v1861_v7 = vpop.f32.mrf.mxu1  ;;  %v1692_v3 = vadd.f32 %v1691_v4, %v1629_v36  ;;  %v2331_v36 = vlaneseq }
 0x1ab   :  { %v1742_v62 = vadd.f32 %v1741_v15, %v1692_v3 }
 0x1b3   :  { %v1696_v23 = vpop.f32.mrf.mxu2  ;;  %v1816_v26 = vpop.f32.mrf.mxu0 }
 0x1b4   :  { %v1865_v5 = vpop.f32.mrf.mxu1  ;;  %v1817_v38 = vadd.f32 %v1816_v26, %v1736_v58  ;;  %v1697_v27 = vadd.f32 %v1696_v23, %v1633_v34  ;;  %v50_v23 = vmul.f32 %v49_v20, %v46_v41  ;;  %v47_v58 = vld [vmem:[%s4006_s5 + $0x8] sm:$0xff] }
 0x1b5   :  { %v2027_v31 = vpop.f32.mrf.mxu3  ;;  %v51_v34 = vmul.f32 %v49_v20, %v47_v58  ;;  %vm2334_vm8 = vcmp.eq.f32.partialorder %v47_v58, 0.0 }
 0x1b6   :  { %v1862_v2 = vadd.f32 %v1861_v7, %v1817_v38  ;;  %v1748_v18 = vadd.f32 %v1747_v37, %v1697_v27  ;;  %v53_v7 = vstv %s2354_s9 }
 0x1bd   :  { %v1820_v17 = vpop.f32.mrf.mxu0 }
 0x1be   :  { %v1910_v16 = vpop.f32.mrf.mxu2  ;;  %v1869_v33 = vpop.f32.mrf.mxu1  ;;  %v1821_v55 = vadd.f32 %v1820_v17, %v1742_v62 }
 0x1bf   :  { %v2031_v21 = vpop.f32.mrf.mxu3  ;;  %v1911_v50 = vadd.f32 %v1910_v16, %v1862_v2  ;;  %v2324_v2 = vstv %s2353_s13 }
 0x1c0   :  { %v1866_v47 = vadd.f32 %v1865_v5, %v1821_v55 }
 0x1c1   :  { %v2028_v32 = vadd.f32 %v2027_v31, %v1911_v50 }
 0x1c7   :  { %v1824_v39 = vpop.f32.mrf.mxu0 }
 0x1c8   :  { %v1918_v45 = vpop.f32.mrf.mxu2  ;;  %v1825_v11 = vadd.f32 %v1824_v39, %v1748_v18  ;;  %v2314_v39 = vstv %s2352_s12 }
 0x1c9   :  { %v2035_v43 = vpop.f32.mrf.mxu3  ;;  %v1919_v57 = vadd.f32 %v1918_v45, %v1866_v47 }
 0x1ca   :  { %v1870_v25 = vadd.f32 %v1869_v33, %v1825_v11  ;;  %v2321_v33 = vld [vmem:[%s4007_s6] sm:$0xff] }
 0x1cb   :  { %v2032_v56 = vadd.f32 %v2031_v21, %v1919_v57  ;;  %v54_v21 = vadd.f32 %v53_v7, %v50_v23  ;;  %v2325_v27 = vmul.f32 %v2324_v2, %v2321_v33  ;;  %v55_v57 = vadd.f32 %v53_v7, %v51_v34 }
 0x1cc   :  { %v2138_v28 = vpop.f32.mrf.mxu1 }
 0x1d2   :  { %v1926_v46 = vpop.f32.mrf.mxu2 }
 0x1d3   :  { %v1927_v60 = vadd.f32 %v1926_v46, %v1870_v25 }
 0x1d4   :  { %v2089_v59 = vpop.f32.mrf.mxu0 }
 0x1d5   :  { %v2090_v42 = vadd.f32 %v2089_v59, %v2028_v32  ;;  %v2144_v14 = vpop.f32.mrf.mxu1  ;;  %v2036_v35 = vadd.f32 %v2035_v43, %v1927_v60  ;;  %v2275_v43 = vadd.f32 %v3941_v1, %v54_v21  ;;  %v2332_v32 = vand.u32 127, %v2331_v36 }
 0x1d6   :  { %v2276_v60 = vadd.f32 %v3943_v61, %v55_v57  ;;  %v2323_v61 = vld [vmem:[%s4007_s6 + $0x10] sm:$0xff] }
 0x1d7   :  { %v2264_v63 = vpop.f32.mrf.mxu3  ;;  %v2139_v6 = vadd.f32 %v2138_v28, %v2090_v42  ;;  %vm2339_vm4 = vcmp.eq.s32.totalorder %v2332_v32, 8 }
 0x1db   :  { %v2219_v53 = vpop.f32.mrf.mxu2 }
 0x1dc   :  { %v2220_v19 = vadd.f32 %v2219_v53, %v2139_v6  ;;  %v2094_v13 = vpop.f32.mrf.mxu0 }
 0x1dd   :  { %v2095_v9 = vadd.f32 %v2094_v13, %v2032_v56  ;;  %v2150_v4 = vpop.f32.mrf.mxu1 }
 0x1de   :  { %v2265_v8 = vadd.f32 %v2264_v63, %v2220_v19  ;;  %v48_v63 = vld [vmem:[%s4006_s5 + $0x10] sm:$0xff]  ;;  %v2322_v19 = vld [vmem:[%s4007_s6 + $0x8] sm:$0xff] }
 0x1df   :  { %v2145_v48 = vadd.f32 %v2144_v14, %v2095_v9  ;;  %v2268_v49 = vpop.f32.mrf.mxu3  ;;  %vm2335_vm11 = vcmp.eq.f32.partialorder %v48_v63, 0.0 }
 0x1e0   :  { %2356 = vrsqrt.f32 %v2265_v8  ;;  %vm2285_vm1 = vcmp.eq.f32.partialorder %v2265_v8, inf  ;;  %v2288_v3 = vand.u32 2147483648, %v2265_v8  ;;  %vm2287_vm2 = vcmp.eq.f32.partialorder %v2265_v8, 0.0 }
 0x1e3   :  { %v2223_v51 = vpop.f32.mrf.mxu2 }
 0x1e4   :  { %v2224_v29 = vadd.f32 %v2223_v51, %v2145_v48  ;;  %v2099_v0 = vpop.f32.mrf.mxu0 }
 0x1e5   :  { %v2100_v52 = vadd.f32 %v2099_v0, %v2036_v35 }
 0x1e6   :  { %v2357_v12 = vpop.eup %2356  ;;  %v3947_v54 = vadd.f32 %v2268_v49, %v2224_v29  ;;  %v2326_v49 = vmul.f32 %v2324_v2, %v2322_v19 }
 0x1e7   :  { %v2279_v44 = vmul.f32 %v2357_v12, %v2265_v8  ;;  %v2151_v24 = vadd.f32 %v2150_v4, %v2100_v52  ;;  %v2272_v16 = vpop.f32.mrf.mxu3 }
 0x1e8   :  { %2358 = vrsqrt.f32 %v3947_v54  ;;  %vm2297_vm6 = vcmp.eq.f32.partialorder %v3947_v54, inf  ;;  %v2300_v53 = vand.u32 2147483648, %v3947_v54  ;;  %vm2299_vm7 = vcmp.eq.f32.partialorder %v3947_v54, 0.0 }
 0x1e9   :  { %v2280_v15 = vmul.f32 %v2357_v12, %v2279_v44 }
 0x1eb   :  { %v2281_v10 = vmul.f32 0.5, %v2280_v15  ;;  %v2227_v37 = vpop.f32.mrf.mxu2 }
 0x1ec   :  { %v2228_v26 = vadd.f32 %v2227_v37, %v2151_v24 }
 0x1ed   :  { %v2282_v31 = vsub.f32 1.5, %v2281_v10  ;;  %v2327_v10 = vmul.f32 %v2324_v2, %v2323_v61 }
 0x1ee   :  { %v2359_v30 = vpop.eup %2358  ;;  %v3953_v17 = vadd.f32 %v2272_v16, %v2228_v26 }
 0x1ef   :  { %v2283_v5 = vmul.f32 %v2357_v12, %v2282_v31  ;;  %v2291_v22 = vmul.f32 %v2359_v30, %v3947_v54 }
 0x1f0   :  { %2360 = vrsqrt.f32 %v3953_v17  ;;  %vm2309_vm9 = vcmp.eq.f32.partialorder %v3953_v17, inf  ;;  %v2312_v52 = vand.u32 2147483648, %v3953_v17  ;;  %vm2311_vm10 = vcmp.eq.f32.partialorder %v3953_v17, 0.0 }
 0x1f1   :  { %v2284_v45 = vmul.f32 %v2283_v5, %v2265_v8  ;;  %v2292_v38 = vmul.f32 %v2359_v30, %v2291_v22 }
 0x1f3   :  { %v2286_v62 = vsel %vm2285_vm1, %v2265_v8, %v2284_v45  ;;  %v2293_v50 = vmul.f32 0.5, %v2292_v38  ;;  %v52_v8 = vmul.f32 %v49_v20, %v48_v63 }
 0x1f4   :  { %v2289_v55 = vsel %vm2287_vm2, %v2288_v3, %v2286_v62 }
 0x1f5   :  { %v2315_v46 = vmul.f32 %v2314_v39, %v2289_v55  ;;  %v2294_v59 = vsub.f32 1.5, %v2293_v50  ;;  %v56_v0 = vadd.f32 %v53_v7, %v52_v8 }
 0x1f6   :  { %v2361_v28 = vpop.eup %2360 }
 0x1f7   :  { %v2318_v47 = vadd.f32 %v2315_v46, %v2275_v43  ;;  %v2295_v42 = vmul.f32 %v2359_v30, %v2294_v59  ;;  %v2303_v18 = vmul.f32 %v2361_v28, %v3953_v17  ;;  %v2277_v4 = vadd.f32 %v3945_v40, %v56_v0 }
 0x1f9   :  { %v2328_v11 = vadd.f32 %v2325_v27, %v2318_v47  ;;  %v2296_v1 = vmul.f32 %v2295_v42, %v3947_v54  ;;  %v2304_v6 = vmul.f32 %v2361_v28, %v2303_v18 }
 0x1fb   :  { %v2336_v56 = vsel %vm2333_vm3, -1e+08, %v2328_v11  ;;  %v2298_v13 = vsel %vm2297_vm6, %v3947_v54, %v2296_v1  ;;  %v2305_v25 = vmul.f32 0.5, %v2304_v6 }
 0x1fc   :  { %v2340_v9 = vsel %vm2339_vm4, 0.0, %v2336_v56  ;;  %v2301_v14 = vsel %vm2299_vm7, %v2300_v53, %v2298_v13 }
 0x1fd   :  { %2344 = vst.msk [vmem:[%s4009_s8] sm:$0xff] %vm2343_vm5, %v2340_v9  ;;  %v2316_v48 = vmul.f32 %v2314_v39, %v2301_v14  ;;  %v2306_v51 = vsub.f32 1.5, %v2305_v25 }
 0x1ff   :  { %v2319_v29 = vadd.f32 %v2316_v48, %v2276_v60  ;;  %v2307_v35 = vmul.f32 %v2361_v28, %v2306_v51 }
 0x201   :  { %v2329_v12 = vadd.f32 %v2326_v49, %v2319_v29  ;;  %v2308_v54 = vmul.f32 %v2307_v35, %v3953_v17 }
 0x203   :  { %v2337_v44 = vsel %vm2334_vm8, -1e+08, %v2329_v12  ;;  %v2310_v41 = vsel %vm2309_vm9, %v3953_v17, %v2308_v54 }
 0x204   :  { %v2341_v20 = vsel %vm2339_vm4, 0.0, %v2337_v44  ;;  %v2313_v15 = vsel %vm2311_vm10, %v2312_v52, %v2310_v41 }
 0x205   :  { %2345 = vst.msk [vmem:[%s4009_s8 + $0x8] sm:$0xff] %vm2343_vm5, %v2341_v20  ;;  %v2317_v24 = vmul.f32 %v2314_v39, %v2313_v15 }
 0x207   :  { %v2320_v37 = vadd.f32 %v2317_v24, %v2277_v4 }
 0x209   :  { %v2330_v23 = vadd.f32 %v2327_v10, %v2320_v37 }
 0x20b   :  { %v2338_v26 = vsel %vm2335_vm11, -1e+08, %v2330_v23 }
 0x20c   :  { %v2342_v7 = vsel %vm2339_vm4, 0.0, %v2338_v26 }
 0x20d   :  { %2346 = vst.msk [vmem:[%s4009_s8 + $0x10] sm:$0xff] %vm2343_vm5, %v2342_v7 }
 0x20e   :  { %2351 = vsyncpa [#allocation3], 1 }

</bundles_post_ra>
